<compile_context>
chip_gen: v5e
topology: v5e:2x2
jax: 0.10.0
libtpu: 0.0.40
codegen_flags: <defaults>
</compile_context>

<pallas_src>
import jax
import jax.numpy as jnp
from jax.experimental import pallas as pl
from jax.experimental.pallas import tpu as pltpu


def _round_up(x, m):
    return ((x + m - 1) // m) * m


def _make_kernel(BB, L, K, F, pad, Lr, Lp):
    def kernel(tok_ref, emb_hbm, w_ref, cb_ref, fcw_ref, fcb_ref, o_ref, x_vmem, sem):
        # tok_ref : SMEM (B, L) int32       token ids (scalar prefetch)
        # emb_hbm : ANY  (VOCAB, E)         embedding table, left in HBM
        # w_ref   : VMEM (K*E, F)           conv weight, im2col layout
        # cb_ref  : VMEM (1, F)             conv bias
        # fcw_ref : VMEM (1, F)             fc weight row
        # fcb_ref : VMEM (1, 1)             fc bias
        # o_ref   : VMEM (BB, 1)            sigmoid output block
        # x_vmem  : VMEM (BB*Lr, E) scratch gathered, zero-padded embeddings
        # sem     : DMA semaphores (BB, L)
        b0 = pl.program_id(0) * BB

        # ---- fused embedding gather (manual DMA), pad rows stay zero -----------------
        x_vmem[...] = jnp.zeros(x_vmem.shape, x_vmem.dtype)
        copies = []
        for bb in range(BB):                 # BB and L are small & static -> unrolled
            for l in range(L):
                tok = tok_ref[b0 + bb, l]
                cp = pltpu.make_async_copy(
                    emb_hbm.at[pl.ds(tok, 1), :],
                    x_vmem.at[pl.ds(bb * Lr + pad + l, 1), :],
                    sem.at[bb, l])
                cp.start()
                copies.append(cp)
        for cp in copies:                    # all gathers in flight, then wait once each
            cp.wait()

        # ---- Conv1d as ONE im2col matmul ----------------------------------------------
        # slab[bb*Lr + t, k*E:(k+1)*E] = x_padded[bb, t + k, :]   (shifts via XLU roll)
        slabs = []
        for bb in range(BB):
            xb = x_vmem[pl.ds(bb * Lr, Lr), :]                          # (Lr, E)
            pieces = [xb if k == 0 else pltpu.roll(xb, shift=Lr - k, axis=0)
                      for k in range(K)]
            slabs.append(jnp.concatenate(pieces, axis=1))               # (Lr, K*E)
        slab = slabs[0] if BB == 1 else jnp.concatenate(slabs, axis=0)  # (BB*Lr, K*E)

        conv = jnp.dot(slab, w_ref[...], preferred_element_type=jnp.float32)  # (BB*Lr, F)
        conv = jnp.maximum(conv + cb_ref[...], 0.0)                     # bias + ReLU (f32)

        # ---- MaxPool1d(2) + mean over pooled time --------------------------------------
        # Pairwise max via one sublane roll; odd rows, rows >= 2*Lp (incl. the roll
        # wraparound row and the Lr-L scratch rows) are masked out below.
        nxt = pltpu.roll(conv, shift=BB * Lr - 1, axis=0)               # nxt[r] = conv[r+1]
        pair = jnp.maximum(conv, nxt).reshape(BB, Lr, F)

        t_idx = jax.lax.broadcasted_iota(jnp.int32, (BB, Lr, F), 1)     # computed once
        keep = (t_idx % 2 == 0) & (t_idx < 2 * Lp)
        feat = jnp.sum(jnp.where(keep, pair, 0.0), axis=1) * (1.0 / Lp)  # (BB, F)

        # ---- Linear(F, 1) + sigmoid: VPU multiply + lane reduce, ONE store -------------
        logits = jnp.sum(feat * fcw_ref[...], axis=1, keepdims=True) + fcb_ref[...]
        o_ref[...] = jax.nn.sigmoid(logits).astype(o_ref.dtype)

    return kernel


def cnn_classifier_forward(token_ids, embed_table, conv_w, conv_b, fc_w, fc_b,
                           kernel_size, *, mxu_dtype=jnp.float32, batch_block=None):
    """Forward pass matching the PyTorch CNNClassifier (inference mode)."""
    B, L = token_ids.shape
    E = embed_table.shape[1]
    F = conv_w.shape[0]
    K = kernel_size
    pad = K // 2
    L_out = L + 2 * pad - K + 1          # PyTorch Conv1d output length (even K -> L+1)
    Lp = L_out // 2                      # MaxPool1d(2) output length
    assert Lp >= 1, "sequence too short for MaxPool1d(2)"
    # Scratch time length: padded sequence rounded to a sublane multiple so all in-kernel
    # rolls / slices / reshapes stay (8,128)-tile aligned.
    Lr = _round_up(L + 2 * pad, 8)

    # Batch elements per grid step. Default: whole batch in one program (single store,
    # single matmul). For large B, lower it (multiple of 8) so v7x's 2 TCs split the
    # "parallel" batch-block axis.
    BB = B if batch_block is None else batch_block
    assert B % BB == 0
    grid = (B // BB,)

    # ---- glue (plain JAX): weight re-layout only; gather/pad happen inside the kernel ----
    w2 = jnp.transpose(conv_w, (2, 1, 0)).reshape(K * E, F).astype(mxu_dtype)  # (K*E, F)
    cb = conv_b.reshape(1, F).astype(jnp.float32)
    fcw = fc_w.reshape(1, F).astype(jnp.float32)
    fcb = fc_b.reshape(1, 1).astype(jnp.float32)
    emb = embed_table.astype(mxu_dtype)
    tok = token_ids.astype(jnp.int32)

    out = pl.pallas_call(
        _make_kernel(BB, L, K, F, pad, Lr, Lp),
        out_shape=jax.ShapeDtypeStruct((B, 1), jnp.float32),
        grid_spec=pltpu.PrefetchScalarGridSpec(
            num_scalar_prefetch=1,                                 # token ids -> SMEM
            grid=grid,
            in_specs=[
                pl.BlockSpec(memory_space=pl.ANY),                 # embedding table (HBM)
                pl.BlockSpec((K * E, F), lambda i, t: (0, 0)),     # conv weight (im2col)
                pl.BlockSpec((1, F), lambda i, t: (0, 0)),         # conv bias
                pl.BlockSpec((1, F), lambda i, t: (0, 0)),         # fc weight row
                pl.BlockSpec((1, 1), lambda i, t: (0, 0)),         # fc bias
            ],
            out_specs=pl.BlockSpec((BB, 1), lambda i, t: (i, 0)),
            scratch_shapes=[
                pltpu.VMEM((BB * Lr, E), mxu_dtype),               # gathered embeddings
                pltpu.SemaphoreType.DMA((BB, L)),                  # one sem per gather DMA
            ],
        ),
        # Batch blocks are independent; at larger shapes (L in the hundreds, F >= 128) tile
        # the time axis on the grid instead and set vmem_limit_bytes (v7x: 64 MiB physical).
        compiler_params=pltpu.CompilerParams(dimension_semantics=("parallel",)),
    )(tok, emb, w2, cb, fcw, fcb)

    return out.reshape(-1)  # matches .view(-1)


def _reference_forward(token_ids, embed_table, conv_w, conv_b, fc_w, fc_b, K):
    """Pure-JAX reference (mirrors the PyTorch graph) for validation."""
    B, L = token_ids.shape
    F = conv_w.shape[0]
    pad = K // 2
    emb = jnp.take(embed_table, token_ids, axis=0)           # (B, L, E)
    xc = jnp.transpose(emb, (0, 2, 1))                       # (B, E, L)  == permute(0,2,1)
    conv = jax.lax.conv_general_dilated(
        xc, conv_w, window_strides=(1,), padding=[(pad, pad)],
        dimension_numbers=("NCH", "OIH", "NCH"))             # (B, F, L_out)
    conv = conv + conv_b[None, :, None]
    r = jnp.maximum(conv, 0.0)
    L_out = r.shape[-1]
    Lp = L_out // 2
    pooled = jnp.max(r[:, :, :2 * Lp].reshape(B, F, Lp, 2), axis=-1)
    feat = jnp.mean(pooled, axis=-1)                         # (B, F)
    logit = feat @ fc_w.T + fc_b
    return jax.nn.sigmoid(logit).reshape(-1)


if __name__ == "__main__":
    # Small shapes consistent with the module.
    B, L = 2, 16          # batch, sequence length
    E = 32                # embed_dim
    F = 64                # num_filters
    K = 3                 # kernel_size
    VOCAB = 5000

    root = jax.random.PRNGKey(0)
    k1, k2, k3, k4, k5, k6 = jax.random.split(root, 6)
    embed_table = jax.random.normal(k1, (VOCAB, E), jnp.float32) * 0.1
    conv_w = jax.random.normal(k2, (F, E, K), jnp.float32) * 0.1
    conv_b = jax.random.normal(k3, (F,), jnp.float32) * 0.1
    fc_w = jax.random.normal(k4, (1, F), jnp.float32) * 0.1
    fc_b = jax.random.normal(k5, (1,), jnp.float32) * 0.1
    x = jax.random.randint(k6, (B, L), 0, VOCAB, dtype=jnp.int32)

    # f32 MXU path (matches the f32 PyTorch semantics).
    out = jax.block_until_ready(
        cnn_classifier_forward(x, embed_table, conv_w, conv_b, fc_w, fc_b, K))
    ref = jax.block_until_ready(
        _reference_forward(x, embed_table, conv_w, conv_b, fc_w, fc_b, K))
    assert out.shape == (B,)
    assert jnp.allclose(out, ref, atol=1e-4, rtol=1e-4), (out, ref)

    # Even kernel_size (conv output length L+1) — exercises the general L_out / Lp logic.
    K4 = 4
    conv_w4 = jax.random.normal(k2, (F, E, K4), jnp.float32) * 0.1
    out4 = jax.block_until_ready(
        cnn_classifier_forward(x, embed_table, conv_w4, conv_b, fc_w, fc_b, K4))
    ref4 = jax.block_until_ready(
        _reference_forward(x, embed_table, conv_w4, conv_b, fc_w, fc_b, K4))
    assert jnp.allclose(out4, ref4, atol=1e-4, rtol=1e-4), (out4, ref4)

    # bf16 MXU-input fast path (v6e/v7x); elementwise math stays f32 inside the kernel.
    out_bf16 = jax.block_until_ready(
        cnn_classifier_forward(x, embed_table, conv_w, conv_b, fc_w, fc_b, K,
                               mxu_dtype=jnp.bfloat16))
    assert jnp.allclose(out_bf16, ref, atol=1e-2, rtol=1e-2), (out_bf16, ref)

    print("KERNEL_OK")
</pallas_src>

<mosaic_0001>
module attributes {stable_mosaic.version = 11 : i64} {
  func.func @kernel(%arg0: i32, %arg1: memref<2x16xi32, #tpu.memory_space<smem>>, %arg2: memref<5000x32xf32, #tpu.memory_space<any>>, %arg3: memref<96x64xf32, #tpu.memory_space<vmem>>, %arg4: memref<1x64xf32, #tpu.memory_space<vmem>>, %arg5: memref<1x64xf32, #tpu.memory_space<vmem>>, %arg6: memref<1x1xf32, #tpu.memory_space<vmem>>, %arg7: memref<2x1xf32, #tpu.memory_space<vmem>>, %arg8: memref<48x32xf32, #tpu.memory_space<vmem>>, %arg9: memref<2x16x!tpu.dma_semaphore, #tpu.memory_space<semaphore_mem>>) attributes {dimension_semantics = [#tpu.dimension_semantics<parallel>], iteration_bounds = array<i64: 1>, scalar_prefetch = 1 : i64, scratch_operands = 2 : i64, tpu.core_type = #tpu.core_type<tc>, window_params = [{}, {pipeline_mode = #tpu.pipeline_mode<synchronous>, transform_indices = @transform_1, window_bounds = array<i64: 96, 64>}, {pipeline_mode = #tpu.pipeline_mode<synchronous>, transform_indices = @transform_2, window_bounds = array<i64: 1, 64>}, {pipeline_mode = #tpu.pipeline_mode<synchronous>, transform_indices = @transform_3, window_bounds = array<i64: 1, 64>}, {pipeline_mode = #tpu.pipeline_mode<synchronous>, transform_indices = @transform_4, window_bounds = array<i64: 1, 1>}, {transform_indices = @transform_5, window_bounds = array<i64: 2, 1>}]} {
    %c2_i32 = arith.constant 2 : i32
    %0 = arith.muli %arg0, %c2_i32 : i32
    %cst = arith.constant 0.000000e+00 : f32
    %1 = vector.broadcast %cst : f32 to vector<48x32xf32>
    %c0 = arith.constant 0 : index
    %c0_0 = arith.constant 0 : index
    %2 = vector.load %arg8[%c0, %c0_0] : memref<48x32xf32, #tpu.memory_space<vmem>>, vector<48x32xf32>
    tpu.vector_store %arg8[%c0, %c0_0], %1 {strides = array<i32>} : memref<48x32xf32, #tpu.memory_space<vmem>>, vector<48x32xf32>,
    %c0_i32 = arith.constant 0 : i32
    %3 = arith.addi %0, %c0_i32 : i32
    %4 = arith.index_cast %3 : i32 to index
    %c0_1 = arith.constant 0 : index
    %5 = memref.load %arg1[%4, %c0_1] : memref<2x16xi32, #tpu.memory_space<smem>>
    %c0_i32_2 = arith.constant 0 : i32
    %c0_i32_3 = arith.constant 0 : i32
    %c0_i32_4 = arith.constant 0 : i32
    %6 = tpu.memref_slice %arg2[%5, %c0_i32_4] : memref<5000x32xf32, #tpu.memory_space<any>> -> memref<1x32xf32, #tpu.memory_space<any>>
    %c1_i32 = arith.constant 1 : i32
    %c0_i32_5 = arith.constant 0 : i32
    %7 = tpu.memref_slice %arg8[%c1_i32, %c0_i32_5] : memref<48x32xf32, #tpu.memory_space<vmem>> -> memref<1x32xf32, #tpu.memory_space<vmem>>
    %8 = tpu.memref_slice %arg9[%c0_i32_2, %c0_i32_3] : memref<2x16x!tpu.dma_semaphore, #tpu.memory_space<semaphore_mem>> -> memref<1x1x!tpu.dma_semaphore, #tpu.memory_space<semaphore_mem>>
    %9 = tpu.memref_squeeze %8 : memref<1x1x!tpu.dma_semaphore, #tpu.memory_space<semaphore_mem>> -> memref<!tpu.dma_semaphore, #tpu.memory_space<semaphore_mem>>
    tpu.enqueue_dma source(%6 : memref<1x32xf32, #tpu.memory_space<any>>) target(%7 : memref<1x32xf32, #tpu.memory_space<vmem>>) target_semaphore(%9 : memref<!tpu.dma_semaphore, #tpu.memory_space<semaphore_mem>>)
    %c0_i32_6 = arith.constant 0 : i32
    %10 = arith.addi %0, %c0_i32_6 : i32
    %11 = arith.index_cast %10 : i32 to index
    %c1 = arith.constant 1 : index
    %12 = memref.load %arg1[%11, %c1] : memref<2x16xi32, #tpu.memory_space<smem>>
    %c0_i32_7 = arith.constant 0 : i32
    %c1_i32_8 = arith.constant 1 : i32
    %c0_i32_9 = arith.constant 0 : i32
    %13 = tpu.memref_slice %arg2[%12, %c0_i32_9] : memref<5000x32xf32, #tpu.memory_space<any>> -> memref<1x32xf32, #tpu.memory_space<any>>
    %c2_i32_10 = arith.constant 2 : i32
    %c0_i32_11 = arith.constant 0 : i32
    %14 = tpu.memref_slice %arg8[%c2_i32_10, %c0_i32_11] : memref<48x32xf32, #tpu.memory_space<vmem>> -> memref<1x32xf32, #tpu.memory_space<vmem>>
    %15 = tpu.memref_slice %arg9[%c0_i32_7, %c1_i32_8] : memref<2x16x!tpu.dma_semaphore, #tpu.memory_space<semaphore_mem>> -> memref<1x1x!tpu.dma_semaphore, #tpu.memory_space<semaphore_mem>>
    %16 = tpu.memref_squeeze %15 : memref<1x1x!tpu.dma_semaphore, #tpu.memory_space<semaphore_mem>> -> memref<!tpu.dma_semaphore, #tpu.memory_space<semaphore_mem>>
    tpu.enqueue_dma source(%13 : memref<1x32xf32, #tpu.memory_space<any>>) target(%14 : memref<1x32xf32, #tpu.memory_space<vmem>>) target_semaphore(%16 : memref<!tpu.dma_semaphore, #tpu.memory_space<semaphore_mem>>)
    %c0_i32_12 = arith.constant 0 : i32
    %17 = arith.addi %0, %c0_i32_12 : i32
    %18 = arith.index_cast %17 : i32 to index
    %c2 = arith.constant 2 : index
    %19 = memref.load %arg1[%18, %c2] : memref<2x16xi32, #tpu.memory_space<smem>>
    %c0_i32_13 = arith.constant 0 : i32
    %c2_i32_14 = arith.constant 2 : i32
    %c0_i32_15 = arith.constant 0 : i32
    %20 = tpu.memref_slice %arg2[%19, %c0_i32_15] : memref<5000x32xf32, #tpu.memory_space<any>> -> memref<1x32xf32, #tpu.memory_space<any>>
    %c3_i32 = arith.constant 3 : i32
    %c0_i32_16 = arith.constant 0 : i32
    %21 = tpu.memref_slice %arg8[%c3_i32, %c0_i32_16] : memref<48x32xf32, #tpu.memory_space<vmem>> -> memref<1x32xf32, #tpu.memory_space<vmem>>
    %22 = tpu.memref_slice %arg9[%c0_i32_13, %c2_i32_14] : memref<2x16x!tpu.dma_semaphore, #tpu.memory_space<semaphore_mem>> -> memref<1x1x!tpu.dma_semaphore, #tpu.memory_space<semaphore_mem>>
    %23 = tpu.memref_squeeze %22 : memref<1x1x!tpu.dma_semaphore, #tpu.memory_space<semaphore_mem>> -> memref<!tpu.dma_semaphore, #tpu.memory_space<semaphore_mem>>
    tpu.enqueue_dma source(%20 : memref<1x32xf32, #tpu.memory_space<any>>) target(%21 : memref<1x32xf32, #tpu.memory_space<vmem>>) target_semaphore(%23 : memref<!tpu.dma_semaphore, #tpu.memory_space<semaphore_mem>>)
    %c0_i32_17 = arith.constant 0 : i32
    %24 = arith.addi %0, %c0_i32_17 : i32
    %25 = arith.index_cast %24 : i32 to index
    %c3 = arith.constant 3 : index
    %26 = memref.load %arg1[%25, %c3] : memref<2x16xi32, #tpu.memory_space<smem>>
    %c0_i32_18 = arith.constant 0 : i32
    %c3_i32_19 = arith.constant 3 : i32
    %c0_i32_20 = arith.constant 0 : i32
    %27 = tpu.memref_slice %arg2[%26, %c0_i32_20] : memref<5000x32xf32, #tpu.memory_space<any>> -> memref<1x32xf32, #tpu.memory_space<any>>
    %c4_i32 = arith.constant 4 : i32
    %c0_i32_21 = arith.constant 0 : i32
    %28 = tpu.memref_slice %arg8[%c4_i32, %c0_i32_21] : memref<48x32xf32, #tpu.memory_space<vmem>> -> memref<1x32xf32, #tpu.memory_space<vmem>>
    %29 = tpu.memref_slice %arg9[%c0_i32_18, %c3_i32_19] : memref<2x16x!tpu.dma_semaphore, #tpu.memory_space<semaphore_mem>> -> memref<1x1x!tpu.dma_semaphore, #tpu.memory_space<semaphore_mem>>
    %30 = tpu.memref_squeeze %29 : memref<1x1x!tpu.dma_semaphore, #tpu.memory_space<semaphore_mem>> -> memref<!tpu.dma_semaphore, #tpu.memory_space<semaphore_mem>>
    tpu.enqueue_dma source(%27 : memref<1x32xf32, #tpu.memory_space<any>>) target(%28 : memref<1x32xf32, #tpu.memory_space<vmem>>) target_semaphore(%30 : memref<!tpu.dma_semaphore, #tpu.memory_space<semaphore_mem>>)
    %c0_i32_22 = arith.constant 0 : i32
    %31 = arith.addi %0, %c0_i32_22 : i32
    %32 = arith.index_cast %31 : i32 to index
    %c4 = arith.constant 4 : index
    %33 = memref.load %arg1[%32, %c4] : memref<2x16xi32, #tpu.memory_space<smem>>
    %c0_i32_23 = arith.constant 0 : i32
    %c4_i32_24 = arith.constant 4 : i32
    %c0_i32_25 = arith.constant 0 : i32
    %34 = tpu.memref_slice %arg2[%33, %c0_i32_25] : memref<5000x32xf32, #tpu.memory_space<any>> -> memref<1x32xf32, #tpu.memory_space<any>>
    %c5_i32 = arith.constant 5 : i32
    %c0_i32_26 = arith.constant 0 : i32
    %35 = tpu.memref_slice %arg8[%c5_i32, %c0_i32_26] : memref<48x32xf32, #tpu.memory_space<vmem>> -> memref<1x32xf32, #tpu.memory_space<vmem>>
    %36 = tpu.memref_slice %arg9[%c0_i32_23, %c4_i32_24] : memref<2x16x!tpu.dma_semaphore, #tpu.memory_space<semaphore_mem>> -> memref<1x1x!tpu.dma_semaphore, #tpu.memory_space<semaphore_mem>>
    %37 = tpu.memref_squeeze %36 : memref<1x1x!tpu.dma_semaphore, #tpu.memory_space<semaphore_mem>> -> memref<!tpu.dma_semaphore, #tpu.memory_space<semaphore_mem>>
    tpu.enqueue_dma source(%34 : memref<1x32xf32, #tpu.memory_space<any>>) target(%35 : memref<1x32xf32, #tpu.memory_space<vmem>>) target_semaphore(%37 : memref<!tpu.dma_semaphore, #tpu.memory_space<semaphore_mem>>)
    %c0_i32_27 = arith.constant 0 : i32
    %38 = arith.addi %0, %c0_i32_27 : i32
    %39 = arith.index_cast %38 : i32 to index
    %c5 = arith.constant 5 : index
    %40 = memref.load %arg1[%39, %c5] : memref<2x16xi32, #tpu.memory_space<smem>>
    %c0_i32_28 = arith.constant 0 : i32
    %c5_i32_29 = arith.constant 5 : i32
    %c0_i32_30 = arith.constant 0 : i32
    %41 = tpu.memref_slice %arg2[%40, %c0_i32_30] : memref<5000x32xf32, #tpu.memory_space<any>> -> memref<1x32xf32, #tpu.memory_space<any>>
    %c6_i32 = arith.constant 6 : i32
    %c0_i32_31 = arith.constant 0 : i32
    %42 = tpu.memref_slice %arg8[%c6_i32, %c0_i32_31] : memref<48x32xf32, #tpu.memory_space<vmem>> -> memref<1x32xf32, #tpu.memory_space<vmem>>
    %43 = tpu.memref_slice %arg9[%c0_i32_28, %c5_i32_29] : memref<2x16x!tpu.dma_semaphore, #tpu.memory_space<semaphore_mem>> -> memref<1x1x!tpu.dma_semaphore, #tpu.memory_space<semaphore_mem>>
    %44 = tpu.memref_squeeze %43 : memref<1x1x!tpu.dma_semaphore, #tpu.memory_space<semaphore_mem>> -> memref<!tpu.dma_semaphore, #tpu.memory_space<semaphore_mem>>
    tpu.enqueue_dma source(%41 : memref<1x32xf32, #tpu.memory_space<any>>) target(%42 : memref<1x32xf32, #tpu.memory_space<vmem>>) target_semaphore(%44 : memref<!tpu.dma_semaphore, #tpu.memory_space<semaphore_mem>>)
    %c0_i32_32 = arith.constant 0 : i32
    %45 = arith.addi %0, %c0_i32_32 : i32
    %46 = arith.index_cast %45 : i32 to index
    %c6 = arith.constant 6 : index
    %47 = memref.load %arg1[%46, %c6] : memref<2x16xi32, #tpu.memory_space<smem>>
    %c0_i32_33 = arith.constant 0 : i32
    %c6_i32_34 = arith.constant 6 : i32
    %c0_i32_35 = arith.constant 0 : i32
    %48 = tpu.memref_slice %arg2[%47, %c0_i32_35] : memref<5000x32xf32, #tpu.memory_space<any>> -> memref<1x32xf32, #tpu.memory_space<any>>
    %c7_i32 = arith.constant 7 : i32
    %c0_i32_36 = arith.constant 0 : i32
    %49 = tpu.memref_slice %arg8[%c7_i32, %c0_i32_36] : memref<48x32xf32, #tpu.memory_space<vmem>> -> memref<1x32xf32, #tpu.memory_space<vmem>>
    %50 = tpu.memref_slice %arg9[%c0_i32_33, %c6_i32_34] : memref<2x16x!tpu.dma_semaphore, #tpu.memory_space<semaphore_mem>> -> memref<1x1x!tpu.dma_semaphore, #tpu.memory_space<semaphore_mem>>
    %51 = tpu.memref_squeeze %50 : memref<1x1x!tpu.dma_semaphore, #tpu.memory_space<semaphore_mem>> -> memref<!tpu.dma_semaphore, #tpu.memory_space<semaphore_mem>>
    tpu.enqueue_dma source(%48 : memref<1x32xf32, #tpu.memory_space<any>>) target(%49 : memref<1x32xf32, #tpu.memory_space<vmem>>) target_semaphore(%51 : memref<!tpu.dma_semaphore, #tpu.memory_space<semaphore_mem>>)
    %c0_i32_37 = arith.constant 0 : i32
    %52 = arith.addi %0, %c0_i32_37 : i32
    %53 = arith.index_cast %52 : i32 to index
    %c7 = arith.constant 7 : index
    %54 = memref.load %arg1[%53, %c7] : memref<2x16xi32, #tpu.memory_space<smem>>
    %c0_i32_38 = arith.constant 0 : i32
    %c7_i32_39 = arith.constant 7 : i32
    %c0_i32_40 = arith.constant 0 : i32
    %55 = tpu.memref_slice %arg2[%54, %c0_i32_40] : memref<5000x32xf32, #tpu.memory_space<any>> -> memref<1x32xf32, #tpu.memory_space<any>>
    %c8_i32 = arith.constant 8 : i32
    %c0_i32_41 = arith.constant 0 : i32
    %56 = tpu.memref_slice %arg8[%c8_i32, %c0_i32_41] : memref<48x32xf32, #tpu.memory_space<vmem>> -> memref<1x32xf32, #tpu.memory_space<vmem>>
    %57 = tpu.memref_slice %arg9[%c0_i32_38, %c7_i32_39] : memref<2x16x!tpu.dma_semaphore, #tpu.memory_space<semaphore_mem>> -> memref<1x1x!tpu.dma_semaphore, #tpu.memory_space<semaphore_mem>>
    %58 = tpu.memref_squeeze %57 : memref<1x1x!tpu.dma_semaphore, #tpu.memory_space<semaphore_mem>> -> memref<!tpu.dma_semaphore, #tpu.memory_space<semaphore_mem>>
    tpu.enqueue_dma source(%55 : memref<1x32xf32, #tpu.memory_space<any>>) target(%56 : memref<1x32xf32, #tpu.memory_space<vmem>>) target_semaphore(%58 : memref<!tpu.dma_semaphore, #tpu.memory_space<semaphore_mem>>)
    %c0_i32_42 = arith.constant 0 : i32
    %59 = arith.addi %0, %c0_i32_42 : i32
    %60 = arith.index_cast %59 : i32 to index
    %c8 = arith.constant 8 : index
    %61 = memref.load %arg1[%60, %c8] : memref<2x16xi32, #tpu.memory_space<smem>>
    %c0_i32_43 = arith.constant 0 : i32
    %c8_i32_44 = arith.constant 8 : i32
    %c0_i32_45 = arith.constant 0 : i32
    %62 = tpu.memref_slice %arg2[%61, %c0_i32_45] : memref<5000x32xf32, #tpu.memory_space<any>> -> memref<1x32xf32, #tpu.memory_space<any>>
    %c9_i32 = arith.constant 9 : i32
    %c0_i32_46 = arith.constant 0 : i32
    %63 = tpu.memref_slice %arg8[%c9_i32, %c0_i32_46] : memref<48x32xf32, #tpu.memory_space<vmem>> -> memref<1x32xf32, #tpu.memory_space<vmem>>
    %64 = tpu.memref_slice %arg9[%c0_i32_43, %c8_i32_44] : memref<2x16x!tpu.dma_semaphore, #tpu.memory_space<semaphore_mem>> -> memref<1x1x!tpu.dma_semaphore, #tpu.memory_space<semaphore_mem>>
    %65 = tpu.memref_squeeze %64 : memref<1x1x!tpu.dma_semaphore, #tpu.memory_space<semaphore_mem>> -> memref<!tpu.dma_semaphore, #tpu.memory_space<semaphore_mem>>
    tpu.enqueue_dma source(%62 : memref<1x32xf32, #tpu.memory_space<any>>) target(%63 : memref<1x32xf32, #tpu.memory_space<vmem>>) target_semaphore(%65 : memref<!tpu.dma_semaphore, #tpu.memory_space<semaphore_mem>>)
    %c0_i32_47 = arith.constant 0 : i32
    %66 = arith.addi %0, %c0_i32_47 : i32
    %67 = arith.index_cast %66 : i32 to index
    %c9 = arith.constant 9 : index
    %68 = memref.load %arg1[%67, %c9] : memref<2x16xi32, #tpu.memory_space<smem>>
    %c0_i32_48 = arith.constant 0 : i32
    %c9_i32_49 = arith.constant 9 : i32
    %c0_i32_50 = arith.constant 0 : i32
    %69 = tpu.memref_slice %arg2[%68, %c0_i32_50] : memref<5000x32xf32, #tpu.memory_space<any>> -> memref<1x32xf32, #tpu.memory_space<any>>
    %c10_i32 = arith.constant 10 : i32
    %c0_i32_51 = arith.constant 0 : i32
    %70 = tpu.memref_slice %arg8[%c10_i32, %c0_i32_51] : memref<48x32xf32, #tpu.memory_space<vmem>> -> memref<1x32xf32, #tpu.memory_space<vmem>>
    %71 = tpu.memref_slice %arg9[%c0_i32_48, %c9_i32_49] : memref<2x16x!tpu.dma_semaphore, #tpu.memory_space<semaphore_mem>> -> memref<1x1x!tpu.dma_semaphore, #tpu.memory_space<semaphore_mem>>
    %72 = tpu.memref_squeeze %71 : memref<1x1x!tpu.dma_semaphore, #tpu.memory_space<semaphore_mem>> -> memref<!tpu.dma_semaphore, #tpu.memory_space<semaphore_mem>>
    tpu.enqueue_dma source(%69 : memref<1x32xf32, #tpu.memory_space<any>>) target(%70 : memref<1x32xf32, #tpu.memory_space<vmem>>) target_semaphore(%72 : memref<!tpu.dma_semaphore, #tpu.memory_space<semaphore_mem>>)
    %c0_i32_52 = arith.constant 0 : i32
    %73 = arith.addi %0, %c0_i32_52 : i32
    %74 = arith.index_cast %73 : i32 to index
    %c10 = arith.constant 10 : index
    %75 = memref.load %arg1[%74, %c10] : memref<2x16xi32, #tpu.memory_space<smem>>
    %c0_i32_53 = arith.constant 0 : i32
    %c10_i32_54 = arith.constant 10 : i32
    %c0_i32_55 = arith.constant 0 : i32
    %76 = tpu.memref_slice %arg2[%75, %c0_i32_55] : memref<5000x32xf32, #tpu.memory_space<any>> -> memref<1x32xf32, #tpu.memory_space<any>>
    %c11_i32 = arith.constant 11 : i32
    %c0_i32_56 = arith.constant 0 : i32
    %77 = tpu.memref_slice %arg8[%c11_i32, %c0_i32_56] : memref<48x32xf32, #tpu.memory_space<vmem>> -> memref<1x32xf32, #tpu.memory_space<vmem>>
    %78 = tpu.memref_slice %arg9[%c0_i32_53, %c10_i32_54] : memref<2x16x!tpu.dma_semaphore, #tpu.memory_space<semaphore_mem>> -> memref<1x1x!tpu.dma_semaphore, #tpu.memory_space<semaphore_mem>>
    %79 = tpu.memref_squeeze %78 : memref<1x1x!tpu.dma_semaphore, #tpu.memory_space<semaphore_mem>> -> memref<!tpu.dma_semaphore, #tpu.memory_space<semaphore_mem>>
    tpu.enqueue_dma source(%76 : memref<1x32xf32, #tpu.memory_space<any>>) target(%77 : memref<1x32xf32, #tpu.memory_space<vmem>>) target_semaphore(%79 : memref<!tpu.dma_semaphore, #tpu.memory_space<semaphore_mem>>)
    %c0_i32_57 = arith.constant 0 : i32
    %80 = arith.addi %0, %c0_i32_57 : i32
    %81 = arith.index_cast %80 : i32 to index
    %c11 = arith.constant 11 : index
    %82 = memref.load %arg1[%81, %c11] : memref<2x16xi32, #tpu.memory_space<smem>>
    %c0_i32_58 = arith.constant 0 : i32
    %c11_i32_59 = arith.constant 11 : i32
    %c0_i32_60 = arith.constant 0 : i32
    %83 = tpu.memref_slice %arg2[%82, %c0_i32_60] : memref<5000x32xf32, #tpu.memory_space<any>> -> memref<1x32xf32, #tpu.memory_space<any>>
    %c12_i32 = arith.constant 12 : i32
    %c0_i32_61 = arith.constant 0 : i32
    %84 = tpu.memref_slice %arg8[%c12_i32, %c0_i32_61] : memref<48x32xf32, #tpu.memory_space<vmem>> -> memref<1x32xf32, #tpu.memory_space<vmem>>
    %85 = tpu.memref_slice %arg9[%c0_i32_58, %c11_i32_59] : memref<2x16x!tpu.dma_semaphore, #tpu.memory_space<semaphore_mem>> -> memref<1x1x!tpu.dma_semaphore, #tpu.memory_space<semaphore_mem>>
    %86 = tpu.memref_squeeze %85 : memref<1x1x!tpu.dma_semaphore, #tpu.memory_space<semaphore_mem>> -> memref<!tpu.dma_semaphore, #tpu.memory_space<semaphore_mem>>
    tpu.enqueue_dma source(%83 : memref<1x32xf32, #tpu.memory_space<any>>) target(%84 : memref<1x32xf32, #tpu.memory_space<vmem>>) target_semaphore(%86 : memref<!tpu.dma_semaphore, #tpu.memory_space<semaphore_mem>>)
    %c0_i32_62 = arith.constant 0 : i32
    %87 = arith.addi %0, %c0_i32_62 : i32
    %88 = arith.index_cast %87 : i32 to index
    %c12 = arith.constant 12 : index
    %89 = memref.load %arg1[%88, %c12] : memref<2x16xi32, #tpu.memory_space<smem>>
    %c0_i32_63 = arith.constant 0 : i32
    %c12_i32_64 = arith.constant 12 : i32
    %c0_i32_65 = arith.constant 0 : i32
    %90 = tpu.memref_slice %arg2[%89, %c0_i32_65] : memref<5000x32xf32, #tpu.memory_space<any>> -> memref<1x32xf32, #tpu.memory_space<any>>
    %c13_i32 = arith.constant 13 : i32
    %c0_i32_66 = arith.constant 0 : i32
    %91 = tpu.memref_slice %arg8[%c13_i32, %c0_i32_66] : memref<48x32xf32, #tpu.memory_space<vmem>> -> memref<1x32xf32, #tpu.memory_space<vmem>>
    %92 = tpu.memref_slice %arg9[%c0_i32_63, %c12_i32_64] : memref<2x16x!tpu.dma_semaphore, #tpu.memory_space<semaphore_mem>> -> memref<1x1x!tpu.dma_semaphore, #tpu.memory_space<semaphore_mem>>
    %93 = tpu.memref_squeeze %92 : memref<1x1x!tpu.dma_semaphore, #tpu.memory_space<semaphore_mem>> -> memref<!tpu.dma_semaphore, #tpu.memory_space<semaphore_mem>>
    tpu.enqueue_dma source(%90 : memref<1x32xf32, #tpu.memory_space<any>>) target(%91 : memref<1x32xf32, #tpu.memory_space<vmem>>) target_semaphore(%93 : memref<!tpu.dma_semaphore, #tpu.memory_space<semaphore_mem>>)
    %c0_i32_67 = arith.constant 0 : i32
    %94 = arith.addi %0, %c0_i32_67 : i32
    %95 = arith.index_cast %94 : i32 to index
    %c13 = arith.constant 13 : index
    %96 = memref.load %arg1[%95, %c13] : memref<2x16xi32, #tpu.memory_space<smem>>
    %c0_i32_68 = arith.constant 0 : i32
    %c13_i32_69 = arith.constant 13 : i32
    %c0_i32_70 = arith.constant 0 : i32
    %97 = tpu.memref_slice %arg2[%96, %c0_i32_70] : memref<5000x32xf32, #tpu.memory_space<any>> -> memref<1x32xf32, #tpu.memory_space<any>>
    %c14_i32 = arith.constant 14 : i32
    %c0_i32_71 = arith.constant 0 : i32
    %98 = tpu.memref_slice %arg8[%c14_i32, %c0_i32_71] : memref<48x32xf32, #tpu.memory_space<vmem>> -> memref<1x32xf32, #tpu.memory_space<vmem>>
    %99 = tpu.memref_slice %arg9[%c0_i32_68, %c13_i32_69] : memref<2x16x!tpu.dma_semaphore, #tpu.memory_space<semaphore_mem>> -> memref<1x1x!tpu.dma_semaphore, #tpu.memory_space<semaphore_mem>>
    %100 = tpu.memref_squeeze %99 : memref<1x1x!tpu.dma_semaphore, #tpu.memory_space<semaphore_mem>> -> memref<!tpu.dma_semaphore, #tpu.memory_space<semaphore_mem>>
    tpu.enqueue_dma source(%97 : memref<1x32xf32, #tpu.memory_space<any>>) target(%98 : memref<1x32xf32, #tpu.memory_space<vmem>>) target_semaphore(%100 : memref<!tpu.dma_semaphore, #tpu.memory_space<semaphore_mem>>)
    %c0_i32_72 = arith.constant 0 : i32
    %101 = arith.addi %0, %c0_i32_72 : i32
    %102 = arith.index_cast %101 : i32 to index
    %c14 = arith.constant 14 : index
    %103 = memref.load %arg1[%102, %c14] : memref<2x16xi32, #tpu.memory_space<smem>>
    %c0_i32_73 = arith.constant 0 : i32
    %c14_i32_74 = arith.constant 14 : i32
    %c0_i32_75 = arith.constant 0 : i32
    %104 = tpu.memref_slice %arg2[%103, %c0_i32_75] : memref<5000x32xf32, #tpu.memory_space<any>> -> memref<1x32xf32, #tpu.memory_space<any>>
    %c15_i32 = arith.constant 15 : i32
    %c0_i32_76 = arith.constant 0 : i32
    %105 = tpu.memref_slice %arg8[%c15_i32, %c0_i32_76] : memref<48x32xf32, #tpu.memory_space<vmem>> -> memref<1x32xf32, #tpu.memory_space<vmem>>
    %106 = tpu.memref_slice %arg9[%c0_i32_73, %c14_i32_74] : memref<2x16x!tpu.dma_semaphore, #tpu.memory_space<semaphore_mem>> -> memref<1x1x!tpu.dma_semaphore, #tpu.memory_space<semaphore_mem>>
    %107 = tpu.memref_squeeze %106 : memref<1x1x!tpu.dma_semaphore, #tpu.memory_space<semaphore_mem>> -> memref<!tpu.dma_semaphore, #tpu.memory_space<semaphore_mem>>
    tpu.enqueue_dma source(%104 : memref<1x32xf32, #tpu.memory_space<any>>) target(%105 : memref<1x32xf32, #tpu.memory_space<vmem>>) target_semaphore(%107 : memref<!tpu.dma_semaphore, #tpu.memory_space<semaphore_mem>>)
    %c0_i32_77 = arith.constant 0 : i32
    %108 = arith.addi %0, %c0_i32_77 : i32
    %109 = arith.index_cast %108 : i32 to index
    %c15 = arith.constant 15 : index
    %110 = memref.load %arg1[%109, %c15] : memref<2x16xi32, #tpu.memory_space<smem>>
    %c0_i32_78 = arith.constant 0 : i32
    %c15_i32_79 = arith.constant 15 : i32
    %c0_i32_80 = arith.constant 0 : i32
    %111 = tpu.memref_slice %arg2[%110, %c0_i32_80] : memref<5000x32xf32, #tpu.memory_space<any>> -> memref<1x32xf32, #tpu.memory_space<any>>
    %c16_i32 = arith.constant 16 : i32
    %c0_i32_81 = arith.constant 0 : i32
    %112 = tpu.memref_slice %arg8[%c16_i32, %c0_i32_81] : memref<48x32xf32, #tpu.memory_space<vmem>> -> memref<1x32xf32, #tpu.memory_space<vmem>>
    %113 = tpu.memref_slice %arg9[%c0_i32_78, %c15_i32_79] : memref<2x16x!tpu.dma_semaphore, #tpu.memory_space<semaphore_mem>> -> memref<1x1x!tpu.dma_semaphore, #tpu.memory_space<semaphore_mem>>
    %114 = tpu.memref_squeeze %113 : memref<1x1x!tpu.dma_semaphore, #tpu.memory_space<semaphore_mem>> -> memref<!tpu.dma_semaphore, #tpu.memory_space<semaphore_mem>>
    tpu.enqueue_dma source(%111 : memref<1x32xf32, #tpu.memory_space<any>>) target(%112 : memref<1x32xf32, #tpu.memory_space<vmem>>) target_semaphore(%114 : memref<!tpu.dma_semaphore, #tpu.memory_space<semaphore_mem>>)
    %c1_i32_82 = arith.constant 1 : i32
    %115 = arith.addi %0, %c1_i32_82 : i32
    %116 = arith.index_cast %115 : i32 to index
    %c0_83 = arith.constant 0 : index
    %117 = memref.load %arg1[%116, %c0_83] : memref<2x16xi32, #tpu.memory_space<smem>>
    %c1_i32_84 = arith.constant 1 : i32
    %c0_i32_85 = arith.constant 0 : i32
    %c0_i32_86 = arith.constant 0 : i32
    %118 = tpu.memref_slice %arg2[%117, %c0_i32_86] : memref<5000x32xf32, #tpu.memory_space<any>> -> memref<1x32xf32, #tpu.memory_space<any>>
    %c25_i32 = arith.constant 25 : i32
    %c0_i32_87 = arith.constant 0 : i32
    %119 = tpu.memref_slice %arg8[%c25_i32, %c0_i32_87] : memref<48x32xf32, #tpu.memory_space<vmem>> -> memref<1x32xf32, #tpu.memory_space<vmem>>
    %120 = tpu.memref_slice %arg9[%c1_i32_84, %c0_i32_85] : memref<2x16x!tpu.dma_semaphore, #tpu.memory_space<semaphore_mem>> -> memref<1x1x!tpu.dma_semaphore, #tpu.memory_space<semaphore_mem>>
    %121 = tpu.memref_squeeze %120 : memref<1x1x!tpu.dma_semaphore, #tpu.memory_space<semaphore_mem>> -> memref<!tpu.dma_semaphore, #tpu.memory_space<semaphore_mem>>
    tpu.enqueue_dma source(%118 : memref<1x32xf32, #tpu.memory_space<any>>) target(%119 : memref<1x32xf32, #tpu.memory_space<vmem>>) target_semaphore(%121 : memref<!tpu.dma_semaphore, #tpu.memory_space<semaphore_mem>>)
    %c1_i32_88 = arith.constant 1 : i32
    %122 = arith.addi %0, %c1_i32_88 : i32
    %123 = arith.index_cast %122 : i32 to index
    %c1_89 = arith.constant 1 : index
    %124 = memref.load %arg1[%123, %c1_89] : memref<2x16xi32, #tpu.memory_space<smem>>
    %c1_i32_90 = arith.constant 1 : i32
    %c1_i32_91 = arith.constant 1 : i32
    %c0_i32_92 = arith.constant 0 : i32
    %125 = tpu.memref_slice %arg2[%124, %c0_i32_92] : memref<5000x32xf32, #tpu.memory_space<any>> -> memref<1x32xf32, #tpu.memory_space<any>>
    %c26_i32 = arith.constant 26 : i32
    %c0_i32_93 = arith.constant 0 : i32
    %126 = tpu.memref_slice %arg8[%c26_i32, %c0_i32_93] : memref<48x32xf32, #tpu.memory_space<vmem>> -> memref<1x32xf32, #tpu.memory_space<vmem>>
    %127 = tpu.memref_slice %arg9[%c1_i32_90, %c1_i32_91] : memref<2x16x!tpu.dma_semaphore, #tpu.memory_space<semaphore_mem>> -> memref<1x1x!tpu.dma_semaphore, #tpu.memory_space<semaphore_mem>>
    %128 = tpu.memref_squeeze %127 : memref<1x1x!tpu.dma_semaphore, #tpu.memory_space<semaphore_mem>> -> memref<!tpu.dma_semaphore, #tpu.memory_space<semaphore_mem>>
    tpu.enqueue_dma source(%125 : memref<1x32xf32, #tpu.memory_space<any>>) target(%126 : memref<1x32xf32, #tpu.memory_space<vmem>>) target_semaphore(%128 : memref<!tpu.dma_semaphore, #tpu.memory_space<semaphore_mem>>)
    %c1_i32_94 = arith.constant 1 : i32
    %129 = arith.addi %0, %c1_i32_94 : i32
    %130 = arith.index_cast %129 : i32 to index
    %c2_95 = arith.constant 2 : index
    %131 = memref.load %arg1[%130, %c2_95] : memref<2x16xi32, #tpu.memory_space<smem>>
    %c1_i32_96 = arith.constant 1 : i32
    %c2_i32_97 = arith.constant 2 : i32
    %c0_i32_98 = arith.constant 0 : i32
    %132 = tpu.memref_slice %arg2[%131, %c0_i32_98] : memref<5000x32xf32, #tpu.memory_space<any>> -> memref<1x32xf32, #tpu.memory_space<any>>
    %c27_i32 = arith.constant 27 : i32
    %c0_i32_99 = arith.constant 0 : i32
    %133 = tpu.memref_slice %arg8[%c27_i32, %c0_i32_99] : memref<48x32xf32, #tpu.memory_space<vmem>> -> memref<1x32xf32, #tpu.memory_space<vmem>>
    %134 = tpu.memref_slice %arg9[%c1_i32_96, %c2_i32_97] : memref<2x16x!tpu.dma_semaphore, #tpu.memory_space<semaphore_mem>> -> memref<1x1x!tpu.dma_semaphore, #tpu.memory_space<semaphore_mem>>
    %135 = tpu.memref_squeeze %134 : memref<1x1x!tpu.dma_semaphore, #tpu.memory_space<semaphore_mem>> -> memref<!tpu.dma_semaphore, #tpu.memory_space<semaphore_mem>>
    tpu.enqueue_dma source(%132 : memref<1x32xf32, #tpu.memory_space<any>>) target(%133 : memref<1x32xf32, #tpu.memory_space<vmem>>) target_semaphore(%135 : memref<!tpu.dma_semaphore, #tpu.memory_space<semaphore_mem>>)
    %c1_i32_100 = arith.constant 1 : i32
    %136 = arith.addi %0, %c1_i32_100 : i32
    %137 = arith.index_cast %136 : i32 to index
    %c3_101 = arith.constant 3 : index
    %138 = memref.load %arg1[%137, %c3_101] : memref<2x16xi32, #tpu.memory_space<smem>>
    %c1_i32_102 = arith.constant 1 : i32
    %c3_i32_103 = arith.constant 3 : i32
    %c0_i32_104 = arith.constant 0 : i32
    %139 = tpu.memref_slice %arg2[%138, %c0_i32_104] : memref<5000x32xf32, #tpu.memory_space<any>> -> memref<1x32xf32, #tpu.memory_space<any>>
    %c28_i32 = arith.constant 28 : i32
    %c0_i32_105 = arith.constant 0 : i32
    %140 = tpu.memref_slice %arg8[%c28_i32, %c0_i32_105] : memref<48x32xf32, #tpu.memory_space<vmem>> -> memref<1x32xf32, #tpu.memory_space<vmem>>
    %141 = tpu.memref_slice %arg9[%c1_i32_102, %c3_i32_103] : memref<2x16x!tpu.dma_semaphore, #tpu.memory_space<semaphore_mem>> -> memref<1x1x!tpu.dma_semaphore, #tpu.memory_space<semaphore_mem>>
    %142 = tpu.memref_squeeze %141 : memref<1x1x!tpu.dma_semaphore, #tpu.memory_space<semaphore_mem>> -> memref<!tpu.dma_semaphore, #tpu.memory_space<semaphore_mem>>
    tpu.enqueue_dma source(%139 : memref<1x32xf32, #tpu.memory_space<any>>) target(%140 : memref<1x32xf32, #tpu.memory_space<vmem>>) target_semaphore(%142 : memref<!tpu.dma_semaphore, #tpu.memory_space<semaphore_mem>>)
    %c1_i32_106 = arith.constant 1 : i32
    %143 = arith.addi %0, %c1_i32_106 : i32
    %144 = arith.index_cast %143 : i32 to index
    %c4_107 = arith.constant 4 : index
    %145 = memref.load %arg1[%144, %c4_107] : memref<2x16xi32, #tpu.memory_space<smem>>
    %c1_i32_108 = arith.constant 1 : i32
    %c4_i32_109 = arith.constant 4 : i32
    %c0_i32_110 = arith.constant 0 : i32
    %146 = tpu.memref_slice %arg2[%145, %c0_i32_110] : memref<5000x32xf32, #tpu.memory_space<any>> -> memref<1x32xf32, #tpu.memory_space<any>>
    %c29_i32 = arith.constant 29 : i32
    %c0_i32_111 = arith.constant 0 : i32
    %147 = tpu.memref_slice %arg8[%c29_i32, %c0_i32_111] : memref<48x32xf32, #tpu.memory_space<vmem>> -> memref<1x32xf32, #tpu.memory_space<vmem>>
    %148 = tpu.memref_slice %arg9[%c1_i32_108, %c4_i32_109] : memref<2x16x!tpu.dma_semaphore, #tpu.memory_space<semaphore_mem>> -> memref<1x1x!tpu.dma_semaphore, #tpu.memory_space<semaphore_mem>>
    %149 = tpu.memref_squeeze %148 : memref<1x1x!tpu.dma_semaphore, #tpu.memory_space<semaphore_mem>> -> memref<!tpu.dma_semaphore, #tpu.memory_space<semaphore_mem>>
    tpu.enqueue_dma source(%146 : memref<1x32xf32, #tpu.memory_space<any>>) target(%147 : memref<1x32xf32, #tpu.memory_space<vmem>>) target_semaphore(%149 : memref<!tpu.dma_semaphore, #tpu.memory_space<semaphore_mem>>)
    %c1_i32_112 = arith.constant 1 : i32
    %150 = arith.addi %0, %c1_i32_112 : i32
    %151 = arith.index_cast %150 : i32 to index
    %c5_113 = arith.constant 5 : index
    %152 = memref.load %arg1[%151, %c5_113] : memref<2x16xi32, #tpu.memory_space<smem>>
    %c1_i32_114 = arith.constant 1 : i32
    %c5_i32_115 = arith.constant 5 : i32
    %c0_i32_116 = arith.constant 0 : i32
    %153 = tpu.memref_slice %arg2[%152, %c0_i32_116] : memref<5000x32xf32, #tpu.memory_space<any>> -> memref<1x32xf32, #tpu.memory_space<any>>
    %c30_i32 = arith.constant 30 : i32
    %c0_i32_117 = arith.constant 0 : i32
    %154 = tpu.memref_slice %arg8[%c30_i32, %c0_i32_117] : memref<48x32xf32, #tpu.memory_space<vmem>> -> memref<1x32xf32, #tpu.memory_space<vmem>>
    %155 = tpu.memref_slice %arg9[%c1_i32_114, %c5_i32_115] : memref<2x16x!tpu.dma_semaphore, #tpu.memory_space<semaphore_mem>> -> memref<1x1x!tpu.dma_semaphore, #tpu.memory_space<semaphore_mem>>
    %156 = tpu.memref_squeeze %155 : memref<1x1x!tpu.dma_semaphore, #tpu.memory_space<semaphore_mem>> -> memref<!tpu.dma_semaphore, #tpu.memory_space<semaphore_mem>>
    tpu.enqueue_dma source(%153 : memref<1x32xf32, #tpu.memory_space<any>>) target(%154 : memref<1x32xf32, #tpu.memory_space<vmem>>) target_semaphore(%156 : memref<!tpu.dma_semaphore, #tpu.memory_space<semaphore_mem>>)
    %c1_i32_118 = arith.constant 1 : i32
    %157 = arith.addi %0, %c1_i32_118 : i32
    %158 = arith.index_cast %157 : i32 to index
    %c6_119 = arith.constant 6 : index
    %159 = memref.load %arg1[%158, %c6_119] : memref<2x16xi32, #tpu.memory_space<smem>>
    %c1_i32_120 = arith.constant 1 : i32
    %c6_i32_121 = arith.constant 6 : i32
    %c0_i32_122 = arith.constant 0 : i32
    %160 = tpu.memref_slice %arg2[%159, %c0_i32_122] : memref<5000x32xf32, #tpu.memory_space<any>> -> memref<1x32xf32, #tpu.memory_space<any>>
    %c31_i32 = arith.constant 31 : i32
    %c0_i32_123 = arith.constant 0 : i32
    %161 = tpu.memref_slice %arg8[%c31_i32, %c0_i32_123] : memref<48x32xf32, #tpu.memory_space<vmem>> -> memref<1x32xf32, #tpu.memory_space<vmem>>
    %162 = tpu.memref_slice %arg9[%c1_i32_120, %c6_i32_121] : memref<2x16x!tpu.dma_semaphore, #tpu.memory_space<semaphore_mem>> -> memref<1x1x!tpu.dma_semaphore, #tpu.memory_space<semaphore_mem>>
    %163 = tpu.memref_squeeze %162 : memref<1x1x!tpu.dma_semaphore, #tpu.memory_space<semaphore_mem>> -> memref<!tpu.dma_semaphore, #tpu.memory_space<semaphore_mem>>
    tpu.enqueue_dma source(%160 : memref<1x32xf32, #tpu.memory_space<any>>) target(%161 : memref<1x32xf32, #tpu.memory_space<vmem>>) target_semaphore(%163 : memref<!tpu.dma_semaphore, #tpu.memory_space<semaphore_mem>>)
    %c1_i32_124 = arith.constant 1 : i32
    %164 = arith.addi %0, %c1_i32_124 : i32
    %165 = arith.index_cast %164 : i32 to index
    %c7_125 = arith.constant 7 : index
    %166 = memref.load %arg1[%165, %c7_125] : memref<2x16xi32, #tpu.memory_space<smem>>
    %c1_i32_126 = arith.constant 1 : i32
    %c7_i32_127 = arith.constant 7 : i32
    %c0_i32_128 = arith.constant 0 : i32
    %167 = tpu.memref_slice %arg2[%166, %c0_i32_128] : memref<5000x32xf32, #tpu.memory_space<any>> -> memref<1x32xf32, #tpu.memory_space<any>>
    %c32_i32 = arith.constant 32 : i32
    %c0_i32_129 = arith.constant 0 : i32
    %168 = tpu.memref_slice %arg8[%c32_i32, %c0_i32_129] : memref<48x32xf32, #tpu.memory_space<vmem>> -> memref<1x32xf32, #tpu.memory_space<vmem>>
    %169 = tpu.memref_slice %arg9[%c1_i32_126, %c7_i32_127] : memref<2x16x!tpu.dma_semaphore, #tpu.memory_space<semaphore_mem>> -> memref<1x1x!tpu.dma_semaphore, #tpu.memory_space<semaphore_mem>>
    %170 = tpu.memref_squeeze %169 : memref<1x1x!tpu.dma_semaphore, #tpu.memory_space<semaphore_mem>> -> memref<!tpu.dma_semaphore, #tpu.memory_space<semaphore_mem>>
    tpu.enqueue_dma source(%167 : memref<1x32xf32, #tpu.memory_space<any>>) target(%168 : memref<1x32xf32, #tpu.memory_space<vmem>>) target_semaphore(%170 : memref<!tpu.dma_semaphore, #tpu.memory_space<semaphore_mem>>)
    %c1_i32_130 = arith.constant 1 : i32
    %171 = arith.addi %0, %c1_i32_130 : i32
    %172 = arith.index_cast %171 : i32 to index
    %c8_131 = arith.constant 8 : index
    %173 = memref.load %arg1[%172, %c8_131] : memref<2x16xi32, #tpu.memory_space<smem>>
    %c1_i32_132 = arith.constant 1 : i32
    %c8_i32_133 = arith.constant 8 : i32
    %c0_i32_134 = arith.constant 0 : i32
    %174 = tpu.memref_slice %arg2[%173, %c0_i32_134] : memref<5000x32xf32, #tpu.memory_space<any>> -> memref<1x32xf32, #tpu.memory_space<any>>
    %c33_i32 = arith.constant 33 : i32
    %c0_i32_135 = arith.constant 0 : i32
    %175 = tpu.memref_slice %arg8[%c33_i32, %c0_i32_135] : memref<48x32xf32, #tpu.memory_space<vmem>> -> memref<1x32xf32, #tpu.memory_space<vmem>>
    %176 = tpu.memref_slice %arg9[%c1_i32_132, %c8_i32_133] : memref<2x16x!tpu.dma_semaphore, #tpu.memory_space<semaphore_mem>> -> memref<1x1x!tpu.dma_semaphore, #tpu.memory_space<semaphore_mem>>
    %177 = tpu.memref_squeeze %176 : memref<1x1x!tpu.dma_semaphore, #tpu.memory_space<semaphore_mem>> -> memref<!tpu.dma_semaphore, #tpu.memory_space<semaphore_mem>>
    tpu.enqueue_dma source(%174 : memref<1x32xf32, #tpu.memory_space<any>>) target(%175 : memref<1x32xf32, #tpu.memory_space<vmem>>) target_semaphore(%177 : memref<!tpu.dma_semaphore, #tpu.memory_space<semaphore_mem>>)
    %c1_i32_136 = arith.constant 1 : i32
    %178 = arith.addi %0, %c1_i32_136 : i32
    %179 = arith.index_cast %178 : i32 to index
    %c9_137 = arith.constant 9 : index
    %180 = memref.load %arg1[%179, %c9_137] : memref<2x16xi32, #tpu.memory_space<smem>>
    %c1_i32_138 = arith.constant 1 : i32
    %c9_i32_139 = arith.constant 9 : i32
    %c0_i32_140 = arith.constant 0 : i32
    %181 = tpu.memref_slice %arg2[%180, %c0_i32_140] : memref<5000x32xf32, #tpu.memory_space<any>> -> memref<1x32xf32, #tpu.memory_space<any>>
    %c34_i32 = arith.constant 34 : i32
    %c0_i32_141 = arith.constant 0 : i32
    %182 = tpu.memref_slice %arg8[%c34_i32, %c0_i32_141] : memref<48x32xf32, #tpu.memory_space<vmem>> -> memref<1x32xf32, #tpu.memory_space<vmem>>
    %183 = tpu.memref_slice %arg9[%c1_i32_138, %c9_i32_139] : memref<2x16x!tpu.dma_semaphore, #tpu.memory_space<semaphore_mem>> -> memref<1x1x!tpu.dma_semaphore, #tpu.memory_space<semaphore_mem>>
    %184 = tpu.memref_squeeze %183 : memref<1x1x!tpu.dma_semaphore, #tpu.memory_space<semaphore_mem>> -> memref<!tpu.dma_semaphore, #tpu.memory_space<semaphore_mem>>
    tpu.enqueue_dma source(%181 : memref<1x32xf32, #tpu.memory_space<any>>) target(%182 : memref<1x32xf32, #tpu.memory_space<vmem>>) target_semaphore(%184 : memref<!tpu.dma_semaphore, #tpu.memory_space<semaphore_mem>>)
    %c1_i32_142 = arith.constant 1 : i32
    %185 = arith.addi %0, %c1_i32_142 : i32
    %186 = arith.index_cast %185 : i32 to index
    %c10_143 = arith.constant 10 : index
    %187 = memref.load %arg1[%186, %c10_143] : memref<2x16xi32, #tpu.memory_space<smem>>
    %c1_i32_144 = arith.constant 1 : i32
    %c10_i32_145 = arith.constant 10 : i32
    %c0_i32_146 = arith.constant 0 : i32
    %188 = tpu.memref_slice %arg2[%187, %c0_i32_146] : memref<5000x32xf32, #tpu.memory_space<any>> -> memref<1x32xf32, #tpu.memory_space<any>>
    %c35_i32 = arith.constant 35 : i32
    %c0_i32_147 = arith.constant 0 : i32
    %189 = tpu.memref_slice %arg8[%c35_i32, %c0_i32_147] : memref<48x32xf32, #tpu.memory_space<vmem>> -> memref<1x32xf32, #tpu.memory_space<vmem>>
    %190 = tpu.memref_slice %arg9[%c1_i32_144, %c10_i32_145] : memref<2x16x!tpu.dma_semaphore, #tpu.memory_space<semaphore_mem>> -> memref<1x1x!tpu.dma_semaphore, #tpu.memory_space<semaphore_mem>>
    %191 = tpu.memref_squeeze %190 : memref<1x1x!tpu.dma_semaphore, #tpu.memory_space<semaphore_mem>> -> memref<!tpu.dma_semaphore, #tpu.memory_space<semaphore_mem>>
    tpu.enqueue_dma source(%188 : memref<1x32xf32, #tpu.memory_space<any>>) target(%189 : memref<1x32xf32, #tpu.memory_space<vmem>>) target_semaphore(%191 : memref<!tpu.dma_semaphore, #tpu.memory_space<semaphore_mem>>)
    %c1_i32_148 = arith.constant 1 : i32
    %192 = arith.addi %0, %c1_i32_148 : i32
    %193 = arith.index_cast %192 : i32 to index
    %c11_149 = arith.constant 11 : index
    %194 = memref.load %arg1[%193, %c11_149] : memref<2x16xi32, #tpu.memory_space<smem>>
    %c1_i32_150 = arith.constant 1 : i32
    %c11_i32_151 = arith.constant 11 : i32
    %c0_i32_152 = arith.constant 0 : i32
    %195 = tpu.memref_slice %arg2[%194, %c0_i32_152] : memref<5000x32xf32, #tpu.memory_space<any>> -> memref<1x32xf32, #tpu.memory_space<any>>
    %c36_i32 = arith.constant 36 : i32
    %c0_i32_153 = arith.constant 0 : i32
    %196 = tpu.memref_slice %arg8[%c36_i32, %c0_i32_153] : memref<48x32xf32, #tpu.memory_space<vmem>> -> memref<1x32xf32, #tpu.memory_space<vmem>>
    %197 = tpu.memref_slice %arg9[%c1_i32_150, %c11_i32_151] : memref<2x16x!tpu.dma_semaphore, #tpu.memory_space<semaphore_mem>> -> memref<1x1x!tpu.dma_semaphore, #tpu.memory_space<semaphore_mem>>
    %198 = tpu.memref_squeeze %197 : memref<1x1x!tpu.dma_semaphore, #tpu.memory_space<semaphore_mem>> -> memref<!tpu.dma_semaphore, #tpu.memory_space<semaphore_mem>>
    tpu.enqueue_dma source(%195 : memref<1x32xf32, #tpu.memory_space<any>>) target(%196 : memref<1x32xf32, #tpu.memory_space<vmem>>) target_semaphore(%198 : memref<!tpu.dma_semaphore, #tpu.memory_space<semaphore_mem>>)
    %c1_i32_154 = arith.constant 1 : i32
    %199 = arith.addi %0, %c1_i32_154 : i32
    %200 = arith.index_cast %199 : i32 to index
    %c12_155 = arith.constant 12 : index
    %201 = memref.load %arg1[%200, %c12_155] : memref<2x16xi32, #tpu.memory_space<smem>>
    %c1_i32_156 = arith.constant 1 : i32
    %c12_i32_157 = arith.constant 12 : i32
    %c0_i32_158 = arith.constant 0 : i32
    %202 = tpu.memref_slice %arg2[%201, %c0_i32_158] : memref<5000x32xf32, #tpu.memory_space<any>> -> memref<1x32xf32, #tpu.memory_space<any>>
    %c37_i32 = arith.constant 37 : i32
    %c0_i32_159 = arith.constant 0 : i32
    %203 = tpu.memref_slice %arg8[%c37_i32, %c0_i32_159] : memref<48x32xf32, #tpu.memory_space<vmem>> -> memref<1x32xf32, #tpu.memory_space<vmem>>
    %204 = tpu.memref_slice %arg9[%c1_i32_156, %c12_i32_157] : memref<2x16x!tpu.dma_semaphore, #tpu.memory_space<semaphore_mem>> -> memref<1x1x!tpu.dma_semaphore, #tpu.memory_space<semaphore_mem>>
    %205 = tpu.memref_squeeze %204 : memref<1x1x!tpu.dma_semaphore, #tpu.memory_space<semaphore_mem>> -> memref<!tpu.dma_semaphore, #tpu.memory_space<semaphore_mem>>
    tpu.enqueue_dma source(%202 : memref<1x32xf32, #tpu.memory_space<any>>) target(%203 : memref<1x32xf32, #tpu.memory_space<vmem>>) target_semaphore(%205 : memref<!tpu.dma_semaphore, #tpu.memory_space<semaphore_mem>>)
    %c1_i32_160 = arith.constant 1 : i32
    %206 = arith.addi %0, %c1_i32_160 : i32
    %207 = arith.index_cast %206 : i32 to index
    %c13_161 = arith.constant 13 : index
    %208 = memref.load %arg1[%207, %c13_161] : memref<2x16xi32, #tpu.memory_space<smem>>
    %c1_i32_162 = arith.constant 1 : i32
    %c13_i32_163 = arith.constant 13 : i32
    %c0_i32_164 = arith.constant 0 : i32
    %209 = tpu.memref_slice %arg2[%208, %c0_i32_164] : memref<5000x32xf32, #tpu.memory_space<any>> -> memref<1x32xf32, #tpu.memory_space<any>>
    %c38_i32 = arith.constant 38 : i32
    %c0_i32_165 = arith.constant 0 : i32
    %210 = tpu.memref_slice %arg8[%c38_i32, %c0_i32_165] : memref<48x32xf32, #tpu.memory_space<vmem>> -> memref<1x32xf32, #tpu.memory_space<vmem>>
    %211 = tpu.memref_slice %arg9[%c1_i32_162, %c13_i32_163] : memref<2x16x!tpu.dma_semaphore, #tpu.memory_space<semaphore_mem>> -> memref<1x1x!tpu.dma_semaphore, #tpu.memory_space<semaphore_mem>>
    %212 = tpu.memref_squeeze %211 : memref<1x1x!tpu.dma_semaphore, #tpu.memory_space<semaphore_mem>> -> memref<!tpu.dma_semaphore, #tpu.memory_space<semaphore_mem>>
    tpu.enqueue_dma source(%209 : memref<1x32xf32, #tpu.memory_space<any>>) target(%210 : memref<1x32xf32, #tpu.memory_space<vmem>>) target_semaphore(%212 : memref<!tpu.dma_semaphore, #tpu.memory_space<semaphore_mem>>)
    %c1_i32_166 = arith.constant 1 : i32
    %213 = arith.addi %0, %c1_i32_166 : i32
    %214 = arith.index_cast %213 : i32 to index
    %c14_167 = arith.constant 14 : index
    %215 = memref.load %arg1[%214, %c14_167] : memref<2x16xi32, #tpu.memory_space<smem>>
    %c1_i32_168 = arith.constant 1 : i32
    %c14_i32_169 = arith.constant 14 : i32
    %c0_i32_170 = arith.constant 0 : i32
    %216 = tpu.memref_slice %arg2[%215, %c0_i32_170] : memref<5000x32xf32, #tpu.memory_space<any>> -> memref<1x32xf32, #tpu.memory_space<any>>
    %c39_i32 = arith.constant 39 : i32
    %c0_i32_171 = arith.constant 0 : i32
    %217 = tpu.memref_slice %arg8[%c39_i32, %c0_i32_171] : memref<48x32xf32, #tpu.memory_space<vmem>> -> memref<1x32xf32, #tpu.memory_space<vmem>>
    %218 = tpu.memref_slice %arg9[%c1_i32_168, %c14_i32_169] : memref<2x16x!tpu.dma_semaphore, #tpu.memory_space<semaphore_mem>> -> memref<1x1x!tpu.dma_semaphore, #tpu.memory_space<semaphore_mem>>
    %219 = tpu.memref_squeeze %218 : memref<1x1x!tpu.dma_semaphore, #tpu.memory_space<semaphore_mem>> -> memref<!tpu.dma_semaphore, #tpu.memory_space<semaphore_mem>>
    tpu.enqueue_dma source(%216 : memref<1x32xf32, #tpu.memory_space<any>>) target(%217 : memref<1x32xf32, #tpu.memory_space<vmem>>) target_semaphore(%219 : memref<!tpu.dma_semaphore, #tpu.memory_space<semaphore_mem>>)
    %c1_i32_172 = arith.constant 1 : i32
    %220 = arith.addi %0, %c1_i32_172 : i32
    %221 = arith.index_cast %220 : i32 to index
    %c15_173 = arith.constant 15 : index
    %222 = memref.load %arg1[%221, %c15_173] : memref<2x16xi32, #tpu.memory_space<smem>>
    %c1_i32_174 = arith.constant 1 : i32
    %c15_i32_175 = arith.constant 15 : i32
    %c0_i32_176 = arith.constant 0 : i32
    %223 = tpu.memref_slice %arg2[%222, %c0_i32_176] : memref<5000x32xf32, #tpu.memory_space<any>> -> memref<1x32xf32, #tpu.memory_space<any>>
    %c40_i32 = arith.constant 40 : i32
    %c0_i32_177 = arith.constant 0 : i32
    %224 = tpu.memref_slice %arg8[%c40_i32, %c0_i32_177] : memref<48x32xf32, #tpu.memory_space<vmem>> -> memref<1x32xf32, #tpu.memory_space<vmem>>
    %225 = tpu.memref_slice %arg9[%c1_i32_174, %c15_i32_175] : memref<2x16x!tpu.dma_semaphore, #tpu.memory_space<semaphore_mem>> -> memref<1x1x!tpu.dma_semaphore, #tpu.memory_space<semaphore_mem>>
    %226 = tpu.memref_squeeze %225 : memref<1x1x!tpu.dma_semaphore, #tpu.memory_space<semaphore_mem>> -> memref<!tpu.dma_semaphore, #tpu.memory_space<semaphore_mem>>
    tpu.enqueue_dma source(%223 : memref<1x32xf32, #tpu.memory_space<any>>) target(%224 : memref<1x32xf32, #tpu.memory_space<vmem>>) target_semaphore(%226 : memref<!tpu.dma_semaphore, #tpu.memory_space<semaphore_mem>>)
    %c0_i32_178 = arith.constant 0 : i32
    %c0_i32_179 = arith.constant 0 : i32
    %c0_i32_180 = arith.constant 0 : i32
    %227 = tpu.memref_slice %arg2[%5, %c0_i32_180] : memref<5000x32xf32, #tpu.memory_space<any>> -> memref<1x32xf32, #tpu.memory_space<any>>
    %c1_i32_181 = arith.constant 1 : i32
    %c0_i32_182 = arith.constant 0 : i32
    %228 = tpu.memref_slice %arg8[%c1_i32_181, %c0_i32_182] : memref<48x32xf32, #tpu.memory_space<vmem>> -> memref<1x32xf32, #tpu.memory_space<vmem>>
    %229 = tpu.memref_slice %arg9[%c0_i32_178, %c0_i32_179] : memref<2x16x!tpu.dma_semaphore, #tpu.memory_space<semaphore_mem>> -> memref<1x1x!tpu.dma_semaphore, #tpu.memory_space<semaphore_mem>>
    %230 = tpu.memref_squeeze %229 : memref<1x1x!tpu.dma_semaphore, #tpu.memory_space<semaphore_mem>> -> memref<!tpu.dma_semaphore, #tpu.memory_space<semaphore_mem>>
    tpu.wait_dma2 semaphore(%230 : memref<!tpu.dma_semaphore, #tpu.memory_space<semaphore_mem>>) src(%227 : memref<1x32xf32, #tpu.memory_space<any>>) dst(%228 : memref<1x32xf32, #tpu.memory_space<vmem>>)
    %c0_i32_183 = arith.constant 0 : i32
    %c1_i32_184 = arith.constant 1 : i32
    %c0_i32_185 = arith.constant 0 : i32
    %231 = tpu.memref_slice %arg2[%12, %c0_i32_185] : memref<5000x32xf32, #tpu.memory_space<any>> -> memref<1x32xf32, #tpu.memory_space<any>>
    %c2_i32_186 = arith.constant 2 : i32
    %c0_i32_187 = arith.constant 0 : i32
    %232 = tpu.memref_slice %arg8[%c2_i32_186, %c0_i32_187] : memref<48x32xf32, #tpu.memory_space<vmem>> -> memref<1x32xf32, #tpu.memory_space<vmem>>
    %233 = tpu.memref_slice %arg9[%c0_i32_183, %c1_i32_184] : memref<2x16x!tpu.dma_semaphore, #tpu.memory_space<semaphore_mem>> -> memref<1x1x!tpu.dma_semaphore, #tpu.memory_space<semaphore_mem>>
    %234 = tpu.memref_squeeze %233 : memref<1x1x!tpu.dma_semaphore, #tpu.memory_space<semaphore_mem>> -> memref<!tpu.dma_semaphore, #tpu.memory_space<semaphore_mem>>
    tpu.wait_dma2 semaphore(%234 : memref<!tpu.dma_semaphore, #tpu.memory_space<semaphore_mem>>) src(%231 : memref<1x32xf32, #tpu.memory_space<any>>) dst(%232 : memref<1x32xf32, #tpu.memory_space<vmem>>)
    %c0_i32_188 = arith.constant 0 : i32
    %c2_i32_189 = arith.constant 2 : i32
    %c0_i32_190 = arith.constant 0 : i32
    %235 = tpu.memref_slice %arg2[%19, %c0_i32_190] : memref<5000x32xf32, #tpu.memory_space<any>> -> memref<1x32xf32, #tpu.memory_space<any>>
    %c3_i32_191 = arith.constant 3 : i32
    %c0_i32_192 = arith.constant 0 : i32
    %236 = tpu.memref_slice %arg8[%c3_i32_191, %c0_i32_192] : memref<48x32xf32, #tpu.memory_space<vmem>> -> memref<1x32xf32, #tpu.memory_space<vmem>>
    %237 = tpu.memref_slice %arg9[%c0_i32_188, %c2_i32_189] : memref<2x16x!tpu.dma_semaphore, #tpu.memory_space<semaphore_mem>> -> memref<1x1x!tpu.dma_semaphore, #tpu.memory_space<semaphore_mem>>
    %238 = tpu.memref_squeeze %237 : memref<1x1x!tpu.dma_semaphore, #tpu.memory_space<semaphore_mem>> -> memref<!tpu.dma_semaphore, #tpu.memory_space<semaphore_mem>>
    tpu.wait_dma2 semaphore(%238 : memref<!tpu.dma_semaphore, #tpu.memory_space<semaphore_mem>>) src(%235 : memref<1x32xf32, #tpu.memory_space<any>>) dst(%236 : memref<1x32xf32, #tpu.memory_space<vmem>>)
    %c0_i32_193 = arith.constant 0 : i32
    %c3_i32_194 = arith.constant 3 : i32
    %c0_i32_195 = arith.constant 0 : i32
    %239 = tpu.memref_slice %arg2[%26, %c0_i32_195] : memref<5000x32xf32, #tpu.memory_space<any>> -> memref<1x32xf32, #tpu.memory_space<any>>
    %c4_i32_196 = arith.constant 4 : i32
    %c0_i32_197 = arith.constant 0 : i32
    %240 = tpu.memref_slice %arg8[%c4_i32_196, %c0_i32_197] : memref<48x32xf32, #tpu.memory_space<vmem>> -> memref<1x32xf32, #tpu.memory_space<vmem>>
    %241 = tpu.memref_slice %arg9[%c0_i32_193, %c3_i32_194] : memref<2x16x!tpu.dma_semaphore, #tpu.memory_space<semaphore_mem>> -> memref<1x1x!tpu.dma_semaphore, #tpu.memory_space<semaphore_mem>>
    %242 = tpu.memref_squeeze %241 : memref<1x1x!tpu.dma_semaphore, #tpu.memory_space<semaphore_mem>> -> memref<!tpu.dma_semaphore, #tpu.memory_space<semaphore_mem>>
    tpu.wait_dma2 semaphore(%242 : memref<!tpu.dma_semaphore, #tpu.memory_space<semaphore_mem>>) src(%239 : memref<1x32xf32, #tpu.memory_space<any>>) dst(%240 : memref<1x32xf32, #tpu.memory_space<vmem>>)
    %c0_i32_198 = arith.constant 0 : i32
    %c4_i32_199 = arith.constant 4 : i32
    %c0_i32_200 = arith.constant 0 : i32
    %243 = tpu.memref_slice %arg2[%33, %c0_i32_200] : memref<5000x32xf32, #tpu.memory_space<any>> -> memref<1x32xf32, #tpu.memory_space<any>>
    %c5_i32_201 = arith.constant 5 : i32
    %c0_i32_202 = arith.constant 0 : i32
    %244 = tpu.memref_slice %arg8[%c5_i32_201, %c0_i32_202] : memref<48x32xf32, #tpu.memory_space<vmem>> -> memref<1x32xf32, #tpu.memory_space<vmem>>
    %245 = tpu.memref_slice %arg9[%c0_i32_198, %c4_i32_199] : memref<2x16x!tpu.dma_semaphore, #tpu.memory_space<semaphore_mem>> -> memref<1x1x!tpu.dma_semaphore, #tpu.memory_space<semaphore_mem>>
    %246 = tpu.memref_squeeze %245 : memref<1x1x!tpu.dma_semaphore, #tpu.memory_space<semaphore_mem>> -> memref<!tpu.dma_semaphore, #tpu.memory_space<semaphore_mem>>
    tpu.wait_dma2 semaphore(%246 : memref<!tpu.dma_semaphore, #tpu.memory_space<semaphore_mem>>) src(%243 : memref<1x32xf32, #tpu.memory_space<any>>) dst(%244 : memref<1x32xf32, #tpu.memory_space<vmem>>)
    %c0_i32_203 = arith.constant 0 : i32
    %c5_i32_204 = arith.constant 5 : i32
    %c0_i32_205 = arith.constant 0 : i32
    %247 = tpu.memref_slice %arg2[%40, %c0_i32_205] : memref<5000x32xf32, #tpu.memory_space<any>> -> memref<1x32xf32, #tpu.memory_space<any>>
    %c6_i32_206 = arith.constant 6 : i32
    %c0_i32_207 = arith.constant 0 : i32
    %248 = tpu.memref_slice %arg8[%c6_i32_206, %c0_i32_207] : memref<48x32xf32, #tpu.memory_space<vmem>> -> memref<1x32xf32, #tpu.memory_space<vmem>>
    %249 = tpu.memref_slice %arg9[%c0_i32_203, %c5_i32_204] : memref<2x16x!tpu.dma_semaphore, #tpu.memory_space<semaphore_mem>> -> memref<1x1x!tpu.dma_semaphore, #tpu.memory_space<semaphore_mem>>
    %250 = tpu.memref_squeeze %249 : memref<1x1x!tpu.dma_semaphore, #tpu.memory_space<semaphore_mem>> -> memref<!tpu.dma_semaphore, #tpu.memory_space<semaphore_mem>>
    tpu.wait_dma2 semaphore(%250 : memref<!tpu.dma_semaphore, #tpu.memory_space<semaphore_mem>>) src(%247 : memref<1x32xf32, #tpu.memory_space<any>>) dst(%248 : memref<1x32xf32, #tpu.memory_space<vmem>>)
    %c0_i32_208 = arith.constant 0 : i32
    %c6_i32_209 = arith.constant 6 : i32
    %c0_i32_210 = arith.constant 0 : i32
    %251 = tpu.memref_slice %arg2[%47, %c0_i32_210] : memref<5000x32xf32, #tpu.memory_space<any>> -> memref<1x32xf32, #tpu.memory_space<any>>
    %c7_i32_211 = arith.constant 7 : i32
    %c0_i32_212 = arith.constant 0 : i32
    %252 = tpu.memref_slice %arg8[%c7_i32_211, %c0_i32_212] : memref<48x32xf32, #tpu.memory_space<vmem>> -> memref<1x32xf32, #tpu.memory_space<vmem>>
    %253 = tpu.memref_slice %arg9[%c0_i32_208, %c6_i32_209] : memref<2x16x!tpu.dma_semaphore, #tpu.memory_space<semaphore_mem>> -> memref<1x1x!tpu.dma_semaphore, #tpu.memory_space<semaphore_mem>>
    %254 = tpu.memref_squeeze %253 : memref<1x1x!tpu.dma_semaphore, #tpu.memory_space<semaphore_mem>> -> memref<!tpu.dma_semaphore, #tpu.memory_space<semaphore_mem>>
    tpu.wait_dma2 semaphore(%254 : memref<!tpu.dma_semaphore, #tpu.memory_space<semaphore_mem>>) src(%251 : memref<1x32xf32, #tpu.memory_space<any>>) dst(%252 : memref<1x32xf32, #tpu.memory_space<vmem>>)
    %c0_i32_213 = arith.constant 0 : i32
    %c7_i32_214 = arith.constant 7 : i32
    %c0_i32_215 = arith.constant 0 : i32
    %255 = tpu.memref_slice %arg2[%54, %c0_i32_215] : memref<5000x32xf32, #tpu.memory_space<any>> -> memref<1x32xf32, #tpu.memory_space<any>>
    %c8_i32_216 = arith.constant 8 : i32
    %c0_i32_217 = arith.constant 0 : i32
    %256 = tpu.memref_slice %arg8[%c8_i32_216, %c0_i32_217] : memref<48x32xf32, #tpu.memory_space<vmem>> -> memref<1x32xf32, #tpu.memory_space<vmem>>
    %257 = tpu.memref_slice %arg9[%c0_i32_213, %c7_i32_214] : memref<2x16x!tpu.dma_semaphore, #tpu.memory_space<semaphore_mem>> -> memref<1x1x!tpu.dma_semaphore, #tpu.memory_space<semaphore_mem>>
    %258 = tpu.memref_squeeze %257 : memref<1x1x!tpu.dma_semaphore, #tpu.memory_space<semaphore_mem>> -> memref<!tpu.dma_semaphore, #tpu.memory_space<semaphore_mem>>
    tpu.wait_dma2 semaphore(%258 : memref<!tpu.dma_semaphore, #tpu.memory_space<semaphore_mem>>) src(%255 : memref<1x32xf32, #tpu.memory_space<any>>) dst(%256 : memref<1x32xf32, #tpu.memory_space<vmem>>)
    %c0_i32_218 = arith.constant 0 : i32
    %c8_i32_219 = arith.constant 8 : i32
    %c0_i32_220 = arith.constant 0 : i32
    %259 = tpu.memref_slice %arg2[%61, %c0_i32_220] : memref<5000x32xf32, #tpu.memory_space<any>> -> memref<1x32xf32, #tpu.memory_space<any>>
    %c9_i32_221 = arith.constant 9 : i32
    %c0_i32_222 = arith.constant 0 : i32
    %260 = tpu.memref_slice %arg8[%c9_i32_221, %c0_i32_222] : memref<48x32xf32, #tpu.memory_space<vmem>> -> memref<1x32xf32, #tpu.memory_space<vmem>>
    %261 = tpu.memref_slice %arg9[%c0_i32_218, %c8_i32_219] : memref<2x16x!tpu.dma_semaphore, #tpu.memory_space<semaphore_mem>> -> memref<1x1x!tpu.dma_semaphore, #tpu.memory_space<semaphore_mem>>
    %262 = tpu.memref_squeeze %261 : memref<1x1x!tpu.dma_semaphore, #tpu.memory_space<semaphore_mem>> -> memref<!tpu.dma_semaphore, #tpu.memory_space<semaphore_mem>>
    tpu.wait_dma2 semaphore(%262 : memref<!tpu.dma_semaphore, #tpu.memory_space<semaphore_mem>>) src(%259 : memref<1x32xf32, #tpu.memory_space<any>>) dst(%260 : memref<1x32xf32, #tpu.memory_space<vmem>>)
    %c0_i32_223 = arith.constant 0 : i32
    %c9_i32_224 = arith.constant 9 : i32
    %c0_i32_225 = arith.constant 0 : i32
    %263 = tpu.memref_slice %arg2[%68, %c0_i32_225] : memref<5000x32xf32, #tpu.memory_space<any>> -> memref<1x32xf32, #tpu.memory_space<any>>
    %c10_i32_226 = arith.constant 10 : i32
    %c0_i32_227 = arith.constant 0 : i32
    %264 = tpu.memref_slice %arg8[%c10_i32_226, %c0_i32_227] : memref<48x32xf32, #tpu.memory_space<vmem>> -> memref<1x32xf32, #tpu.memory_space<vmem>>
    %265 = tpu.memref_slice %arg9[%c0_i32_223, %c9_i32_224] : memref<2x16x!tpu.dma_semaphore, #tpu.memory_space<semaphore_mem>> -> memref<1x1x!tpu.dma_semaphore, #tpu.memory_space<semaphore_mem>>
    %266 = tpu.memref_squeeze %265 : memref<1x1x!tpu.dma_semaphore, #tpu.memory_space<semaphore_mem>> -> memref<!tpu.dma_semaphore, #tpu.memory_space<semaphore_mem>>
    tpu.wait_dma2 semaphore(%266 : memref<!tpu.dma_semaphore, #tpu.memory_space<semaphore_mem>>) src(%263 : memref<1x32xf32, #tpu.memory_space<any>>) dst(%264 : memref<1x32xf32, #tpu.memory_space<vmem>>)
    %c0_i32_228 = arith.constant 0 : i32
    %c10_i32_229 = arith.constant 10 : i32
    %c0_i32_230 = arith.constant 0 : i32
    %267 = tpu.memref_slice %arg2[%75, %c0_i32_230] : memref<5000x32xf32, #tpu.memory_space<any>> -> memref<1x32xf32, #tpu.memory_space<any>>
    %c11_i32_231 = arith.constant 11 : i32
    %c0_i32_232 = arith.constant 0 : i32
    %268 = tpu.memref_slice %arg8[%c11_i32_231, %c0_i32_232] : memref<48x32xf32, #tpu.memory_space<vmem>> -> memref<1x32xf32, #tpu.memory_space<vmem>>
    %269 = tpu.memref_slice %arg9[%c0_i32_228, %c10_i32_229] : memref<2x16x!tpu.dma_semaphore, #tpu.memory_space<semaphore_mem>> -> memref<1x1x!tpu.dma_semaphore, #tpu.memory_space<semaphore_mem>>
    %270 = tpu.memref_squeeze %269 : memref<1x1x!tpu.dma_semaphore, #tpu.memory_space<semaphore_mem>> -> memref<!tpu.dma_semaphore, #tpu.memory_space<semaphore_mem>>
    tpu.wait_dma2 semaphore(%270 : memref<!tpu.dma_semaphore, #tpu.memory_space<semaphore_mem>>) src(%267 : memref<1x32xf32, #tpu.memory_space<any>>) dst(%268 : memref<1x32xf32, #tpu.memory_space<vmem>>)
    %c0_i32_233 = arith.constant 0 : i32
    %c11_i32_234 = arith.constant 11 : i32
    %c0_i32_235 = arith.constant 0 : i32
    %271 = tpu.memref_slice %arg2[%82, %c0_i32_235] : memref<5000x32xf32, #tpu.memory_space<any>> -> memref<1x32xf32, #tpu.memory_space<any>>
    %c12_i32_236 = arith.constant 12 : i32
    %c0_i32_237 = arith.constant 0 : i32
    %272 = tpu.memref_slice %arg8[%c12_i32_236, %c0_i32_237] : memref<48x32xf32, #tpu.memory_space<vmem>> -> memref<1x32xf32, #tpu.memory_space<vmem>>
    %273 = tpu.memref_slice %arg9[%c0_i32_233, %c11_i32_234] : memref<2x16x!tpu.dma_semaphore, #tpu.memory_space<semaphore_mem>> -> memref<1x1x!tpu.dma_semaphore, #tpu.memory_space<semaphore_mem>>
    %274 = tpu.memref_squeeze %273 : memref<1x1x!tpu.dma_semaphore, #tpu.memory_space<semaphore_mem>> -> memref<!tpu.dma_semaphore, #tpu.memory_space<semaphore_mem>>
    tpu.wait_dma2 semaphore(%274 : memref<!tpu.dma_semaphore, #tpu.memory_space<semaphore_mem>>) src(%271 : memref<1x32xf32, #tpu.memory_space<any>>) dst(%272 : memref<1x32xf32, #tpu.memory_space<vmem>>)
    %c0_i32_238 = arith.constant 0 : i32
    %c12_i32_239 = arith.constant 12 : i32
    %c0_i32_240 = arith.constant 0 : i32
    %275 = tpu.memref_slice %arg2[%89, %c0_i32_240] : memref<5000x32xf32, #tpu.memory_space<any>> -> memref<1x32xf32, #tpu.memory_space<any>>
    %c13_i32_241 = arith.constant 13 : i32
    %c0_i32_242 = arith.constant 0 : i32
    %276 = tpu.memref_slice %arg8[%c13_i32_241, %c0_i32_242] : memref<48x32xf32, #tpu.memory_space<vmem>> -> memref<1x32xf32, #tpu.memory_space<vmem>>
    %277 = tpu.memref_slice %arg9[%c0_i32_238, %c12_i32_239] : memref<2x16x!tpu.dma_semaphore, #tpu.memory_space<semaphore_mem>> -> memref<1x1x!tpu.dma_semaphore, #tpu.memory_space<semaphore_mem>>
    %278 = tpu.memref_squeeze %277 : memref<1x1x!tpu.dma_semaphore, #tpu.memory_space<semaphore_mem>> -> memref<!tpu.dma_semaphore, #tpu.memory_space<semaphore_mem>>
    tpu.wait_dma2 semaphore(%278 : memref<!tpu.dma_semaphore, #tpu.memory_space<semaphore_mem>>) src(%275 : memref<1x32xf32, #tpu.memory_space<any>>) dst(%276 : memref<1x32xf32, #tpu.memory_space<vmem>>)
    %c0_i32_243 = arith.constant 0 : i32
    %c13_i32_244 = arith.constant 13 : i32
    %c0_i32_245 = arith.constant 0 : i32
    %279 = tpu.memref_slice %arg2[%96, %c0_i32_245] : memref<5000x32xf32, #tpu.memory_space<any>> -> memref<1x32xf32, #tpu.memory_space<any>>
    %c14_i32_246 = arith.constant 14 : i32
    %c0_i32_247 = arith.constant 0 : i32
    %280 = tpu.memref_slice %arg8[%c14_i32_246, %c0_i32_247] : memref<48x32xf32, #tpu.memory_space<vmem>> -> memref<1x32xf32, #tpu.memory_space<vmem>>
    %281 = tpu.memref_slice %arg9[%c0_i32_243, %c13_i32_244] : memref<2x16x!tpu.dma_semaphore, #tpu.memory_space<semaphore_mem>> -> memref<1x1x!tpu.dma_semaphore, #tpu.memory_space<semaphore_mem>>
    %282 = tpu.memref_squeeze %281 : memref<1x1x!tpu.dma_semaphore, #tpu.memory_space<semaphore_mem>> -> memref<!tpu.dma_semaphore, #tpu.memory_space<semaphore_mem>>
    tpu.wait_dma2 semaphore(%282 : memref<!tpu.dma_semaphore, #tpu.memory_space<semaphore_mem>>) src(%279 : memref<1x32xf32, #tpu.memory_space<any>>) dst(%280 : memref<1x32xf32, #tpu.memory_space<vmem>>)
    %c0_i32_248 = arith.constant 0 : i32
    %c14_i32_249 = arith.constant 14 : i32
    %c0_i32_250 = arith.constant 0 : i32
    %283 = tpu.memref_slice %arg2[%103, %c0_i32_250] : memref<5000x32xf32, #tpu.memory_space<any>> -> memref<1x32xf32, #tpu.memory_space<any>>
    %c15_i32_251 = arith.constant 15 : i32
    %c0_i32_252 = arith.constant 0 : i32
    %284 = tpu.memref_slice %arg8[%c15_i32_251, %c0_i32_252] : memref<48x32xf32, #tpu.memory_space<vmem>> -> memref<1x32xf32, #tpu.memory_space<vmem>>
    %285 = tpu.memref_slice %arg9[%c0_i32_248, %c14_i32_249] : memref<2x16x!tpu.dma_semaphore, #tpu.memory_space<semaphore_mem>> -> memref<1x1x!tpu.dma_semaphore, #tpu.memory_space<semaphore_mem>>
    %286 = tpu.memref_squeeze %285 : memref<1x1x!tpu.dma_semaphore, #tpu.memory_space<semaphore_mem>> -> memref<!tpu.dma_semaphore, #tpu.memory_space<semaphore_mem>>
    tpu.wait_dma2 semaphore(%286 : memref<!tpu.dma_semaphore, #tpu.memory_space<semaphore_mem>>) src(%283 : memref<1x32xf32, #tpu.memory_space<any>>) dst(%284 : memref<1x32xf32, #tpu.memory_space<vmem>>)
    %c0_i32_253 = arith.constant 0 : i32
    %c15_i32_254 = arith.constant 15 : i32
    %c0_i32_255 = arith.constant 0 : i32
    %287 = tpu.memref_slice %arg2[%110, %c0_i32_255] : memref<5000x32xf32, #tpu.memory_space<any>> -> memref<1x32xf32, #tpu.memory_space<any>>
    %c16_i32_256 = arith.constant 16 : i32
    %c0_i32_257 = arith.constant 0 : i32
    %288 = tpu.memref_slice %arg8[%c16_i32_256, %c0_i32_257] : memref<48x32xf32, #tpu.memory_space<vmem>> -> memref<1x32xf32, #tpu.memory_space<vmem>>
    %289 = tpu.memref_slice %arg9[%c0_i32_253, %c15_i32_254] : memref<2x16x!tpu.dma_semaphore, #tpu.memory_space<semaphore_mem>> -> memref<1x1x!tpu.dma_semaphore, #tpu.memory_space<semaphore_mem>>
    %290 = tpu.memref_squeeze %289 : memref<1x1x!tpu.dma_semaphore, #tpu.memory_space<semaphore_mem>> -> memref<!tpu.dma_semaphore, #tpu.memory_space<semaphore_mem>>
    tpu.wait_dma2 semaphore(%290 : memref<!tpu.dma_semaphore, #tpu.memory_space<semaphore_mem>>) src(%287 : memref<1x32xf32, #tpu.memory_space<any>>) dst(%288 : memref<1x32xf32, #tpu.memory_space<vmem>>)
    %c1_i32_258 = arith.constant 1 : i32
    %c0_i32_259 = arith.constant 0 : i32
    %c0_i32_260 = arith.constant 0 : i32
    %291 = tpu.memref_slice %arg2[%117, %c0_i32_260] : memref<5000x32xf32, #tpu.memory_space<any>> -> memref<1x32xf32, #tpu.memory_space<any>>
    %c25_i32_261 = arith.constant 25 : i32
    %c0_i32_262 = arith.constant 0 : i32
    %292 = tpu.memref_slice %arg8[%c25_i32_261, %c0_i32_262] : memref<48x32xf32, #tpu.memory_space<vmem>> -> memref<1x32xf32, #tpu.memory_space<vmem>>
    %293 = tpu.memref_slice %arg9[%c1_i32_258, %c0_i32_259] : memref<2x16x!tpu.dma_semaphore, #tpu.memory_space<semaphore_mem>> -> memref<1x1x!tpu.dma_semaphore, #tpu.memory_space<semaphore_mem>>
    %294 = tpu.memref_squeeze %293 : memref<1x1x!tpu.dma_semaphore, #tpu.memory_space<semaphore_mem>> -> memref<!tpu.dma_semaphore, #tpu.memory_space<semaphore_mem>>
    tpu.wait_dma2 semaphore(%294 : memref<!tpu.dma_semaphore, #tpu.memory_space<semaphore_mem>>) src(%291 : memref<1x32xf32, #tpu.memory_space<any>>) dst(%292 : memref<1x32xf32, #tpu.memory_space<vmem>>)
    %c1_i32_263 = arith.constant 1 : i32
    %c1_i32_264 = arith.constant 1 : i32
    %c0_i32_265 = arith.constant 0 : i32
    %295 = tpu.memref_slice %arg2[%124, %c0_i32_265] : memref<5000x32xf32, #tpu.memory_space<any>> -> memref<1x32xf32, #tpu.memory_space<any>>
    %c26_i32_266 = arith.constant 26 : i32
    %c0_i32_267 = arith.constant 0 : i32
    %296 = tpu.memref_slice %arg8[%c26_i32_266, %c0_i32_267] : memref<48x32xf32, #tpu.memory_space<vmem>> -> memref<1x32xf32, #tpu.memory_space<vmem>>
    %297 = tpu.memref_slice %arg9[%c1_i32_263, %c1_i32_264] : memref<2x16x!tpu.dma_semaphore, #tpu.memory_space<semaphore_mem>> -> memref<1x1x!tpu.dma_semaphore, #tpu.memory_space<semaphore_mem>>
    %298 = tpu.memref_squeeze %297 : memref<1x1x!tpu.dma_semaphore, #tpu.memory_space<semaphore_mem>> -> memref<!tpu.dma_semaphore, #tpu.memory_space<semaphore_mem>>
    tpu.wait_dma2 semaphore(%298 : memref<!tpu.dma_semaphore, #tpu.memory_space<semaphore_mem>>) src(%295 : memref<1x32xf32, #tpu.memory_space<any>>) dst(%296 : memref<1x32xf32, #tpu.memory_space<vmem>>)
    %c1_i32_268 = arith.constant 1 : i32
    %c2_i32_269 = arith.constant 2 : i32
    %c0_i32_270 = arith.constant 0 : i32
    %299 = tpu.memref_slice %arg2[%131, %c0_i32_270] : memref<5000x32xf32, #tpu.memory_space<any>> -> memref<1x32xf32, #tpu.memory_space<any>>
    %c27_i32_271 = arith.constant 27 : i32
    %c0_i32_272 = arith.constant 0 : i32
    %300 = tpu.memref_slice %arg8[%c27_i32_271, %c0_i32_272] : memref<48x32xf32, #tpu.memory_space<vmem>> -> memref<1x32xf32, #tpu.memory_space<vmem>>
    %301 = tpu.memref_slice %arg9[%c1_i32_268, %c2_i32_269] : memref<2x16x!tpu.dma_semaphore, #tpu.memory_space<semaphore_mem>> -> memref<1x1x!tpu.dma_semaphore, #tpu.memory_space<semaphore_mem>>
    %302 = tpu.memref_squeeze %301 : memref<1x1x!tpu.dma_semaphore, #tpu.memory_space<semaphore_mem>> -> memref<!tpu.dma_semaphore, #tpu.memory_space<semaphore_mem>>
    tpu.wait_dma2 semaphore(%302 : memref<!tpu.dma_semaphore, #tpu.memory_space<semaphore_mem>>) src(%299 : memref<1x32xf32, #tpu.memory_space<any>>) dst(%300 : memref<1x32xf32, #tpu.memory_space<vmem>>)
    %c1_i32_273 = arith.constant 1 : i32
    %c3_i32_274 = arith.constant 3 : i32
    %c0_i32_275 = arith.constant 0 : i32
    %303 = tpu.memref_slice %arg2[%138, %c0_i32_275] : memref<5000x32xf32, #tpu.memory_space<any>> -> memref<1x32xf32, #tpu.memory_space<any>>
    %c28_i32_276 = arith.constant 28 : i32
    %c0_i32_277 = arith.constant 0 : i32
    %304 = tpu.memref_slice %arg8[%c28_i32_276, %c0_i32_277] : memref<48x32xf32, #tpu.memory_space<vmem>> -> memref<1x32xf32, #tpu.memory_space<vmem>>
    %305 = tpu.memref_slice %arg9[%c1_i32_273, %c3_i32_274] : memref<2x16x!tpu.dma_semaphore, #tpu.memory_space<semaphore_mem>> -> memref<1x1x!tpu.dma_semaphore, #tpu.memory_space<semaphore_mem>>
    %306 = tpu.memref_squeeze %305 : memref<1x1x!tpu.dma_semaphore, #tpu.memory_space<semaphore_mem>> -> memref<!tpu.dma_semaphore, #tpu.memory_space<semaphore_mem>>
    tpu.wait_dma2 semaphore(%306 : memref<!tpu.dma_semaphore, #tpu.memory_space<semaphore_mem>>) src(%303 : memref<1x32xf32, #tpu.memory_space<any>>) dst(%304 : memref<1x32xf32, #tpu.memory_space<vmem>>)
    %c1_i32_278 = arith.constant 1 : i32
    %c4_i32_279 = arith.constant 4 : i32
    %c0_i32_280 = arith.constant 0 : i32
    %307 = tpu.memref_slice %arg2[%145, %c0_i32_280] : memref<5000x32xf32, #tpu.memory_space<any>> -> memref<1x32xf32, #tpu.memory_space<any>>
    %c29_i32_281 = arith.constant 29 : i32
    %c0_i32_282 = arith.constant 0 : i32
    %308 = tpu.memref_slice %arg8[%c29_i32_281, %c0_i32_282] : memref<48x32xf32, #tpu.memory_space<vmem>> -> memref<1x32xf32, #tpu.memory_space<vmem>>
    %309 = tpu.memref_slice %arg9[%c1_i32_278, %c4_i32_279] : memref<2x16x!tpu.dma_semaphore, #tpu.memory_space<semaphore_mem>> -> memref<1x1x!tpu.dma_semaphore, #tpu.memory_space<semaphore_mem>>
    %310 = tpu.memref_squeeze %309 : memref<1x1x!tpu.dma_semaphore, #tpu.memory_space<semaphore_mem>> -> memref<!tpu.dma_semaphore, #tpu.memory_space<semaphore_mem>>
    tpu.wait_dma2 semaphore(%310 : memref<!tpu.dma_semaphore, #tpu.memory_space<semaphore_mem>>) src(%307 : memref<1x32xf32, #tpu.memory_space<any>>) dst(%308 : memref<1x32xf32, #tpu.memory_space<vmem>>)
    %c1_i32_283 = arith.constant 1 : i32
    %c5_i32_284 = arith.constant 5 : i32
    %c0_i32_285 = arith.constant 0 : i32
    %311 = tpu.memref_slice %arg2[%152, %c0_i32_285] : memref<5000x32xf32, #tpu.memory_space<any>> -> memref<1x32xf32, #tpu.memory_space<any>>
    %c30_i32_286 = arith.constant 30 : i32
    %c0_i32_287 = arith.constant 0 : i32
    %312 = tpu.memref_slice %arg8[%c30_i32_286, %c0_i32_287] : memref<48x32xf32, #tpu.memory_space<vmem>> -> memref<1x32xf32, #tpu.memory_space<vmem>>
    %313 = tpu.memref_slice %arg9[%c1_i32_283, %c5_i32_284] : memref<2x16x!tpu.dma_semaphore, #tpu.memory_space<semaphore_mem>> -> memref<1x1x!tpu.dma_semaphore, #tpu.memory_space<semaphore_mem>>
    %314 = tpu.memref_squeeze %313 : memref<1x1x!tpu.dma_semaphore, #tpu.memory_space<semaphore_mem>> -> memref<!tpu.dma_semaphore, #tpu.memory_space<semaphore_mem>>
    tpu.wait_dma2 semaphore(%314 : memref<!tpu.dma_semaphore, #tpu.memory_space<semaphore_mem>>) src(%311 : memref<1x32xf32, #tpu.memory_space<any>>) dst(%312 : memref<1x32xf32, #tpu.memory_space<vmem>>)
    %c1_i32_288 = arith.constant 1 : i32
    %c6_i32_289 = arith.constant 6 : i32
    %c0_i32_290 = arith.constant 0 : i32
    %315 = tpu.memref_slice %arg2[%159, %c0_i32_290] : memref<5000x32xf32, #tpu.memory_space<any>> -> memref<1x32xf32, #tpu.memory_space<any>>
    %c31_i32_291 = arith.constant 31 : i32
    %c0_i32_292 = arith.constant 0 : i32
    %316 = tpu.memref_slice %arg8[%c31_i32_291, %c0_i32_292] : memref<48x32xf32, #tpu.memory_space<vmem>> -> memref<1x32xf32, #tpu.memory_space<vmem>>
    %317 = tpu.memref_slice %arg9[%c1_i32_288, %c6_i32_289] : memref<2x16x!tpu.dma_semaphore, #tpu.memory_space<semaphore_mem>> -> memref<1x1x!tpu.dma_semaphore, #tpu.memory_space<semaphore_mem>>
    %318 = tpu.memref_squeeze %317 : memref<1x1x!tpu.dma_semaphore, #tpu.memory_space<semaphore_mem>> -> memref<!tpu.dma_semaphore, #tpu.memory_space<semaphore_mem>>
    tpu.wait_dma2 semaphore(%318 : memref<!tpu.dma_semaphore, #tpu.memory_space<semaphore_mem>>) src(%315 : memref<1x32xf32, #tpu.memory_space<any>>) dst(%316 : memref<1x32xf32, #tpu.memory_space<vmem>>)
    %c1_i32_293 = arith.constant 1 : i32
    %c7_i32_294 = arith.constant 7 : i32
    %c0_i32_295 = arith.constant 0 : i32
    %319 = tpu.memref_slice %arg2[%166, %c0_i32_295] : memref<5000x32xf32, #tpu.memory_space<any>> -> memref<1x32xf32, #tpu.memory_space<any>>
    %c32_i32_296 = arith.constant 32 : i32
    %c0_i32_297 = arith.constant 0 : i32
    %320 = tpu.memref_slice %arg8[%c32_i32_296, %c0_i32_297] : memref<48x32xf32, #tpu.memory_space<vmem>> -> memref<1x32xf32, #tpu.memory_space<vmem>>
    %321 = tpu.memref_slice %arg9[%c1_i32_293, %c7_i32_294] : memref<2x16x!tpu.dma_semaphore, #tpu.memory_space<semaphore_mem>> -> memref<1x1x!tpu.dma_semaphore, #tpu.memory_space<semaphore_mem>>
    %322 = tpu.memref_squeeze %321 : memref<1x1x!tpu.dma_semaphore, #tpu.memory_space<semaphore_mem>> -> memref<!tpu.dma_semaphore, #tpu.memory_space<semaphore_mem>>
    tpu.wait_dma2 semaphore(%322 : memref<!tpu.dma_semaphore, #tpu.memory_space<semaphore_mem>>) src(%319 : memref<1x32xf32, #tpu.memory_space<any>>) dst(%320 : memref<1x32xf32, #tpu.memory_space<vmem>>)
    %c1_i32_298 = arith.constant 1 : i32
    %c8_i32_299 = arith.constant 8 : i32
    %c0_i32_300 = arith.constant 0 : i32
    %323 = tpu.memref_slice %arg2[%173, %c0_i32_300] : memref<5000x32xf32, #tpu.memory_space<any>> -> memref<1x32xf32, #tpu.memory_space<any>>
    %c33_i32_301 = arith.constant 33 : i32
    %c0_i32_302 = arith.constant 0 : i32
    %324 = tpu.memref_slice %arg8[%c33_i32_301, %c0_i32_302] : memref<48x32xf32, #tpu.memory_space<vmem>> -> memref<1x32xf32, #tpu.memory_space<vmem>>
    %325 = tpu.memref_slice %arg9[%c1_i32_298, %c8_i32_299] : memref<2x16x!tpu.dma_semaphore, #tpu.memory_space<semaphore_mem>> -> memref<1x1x!tpu.dma_semaphore, #tpu.memory_space<semaphore_mem>>
    %326 = tpu.memref_squeeze %325 : memref<1x1x!tpu.dma_semaphore, #tpu.memory_space<semaphore_mem>> -> memref<!tpu.dma_semaphore, #tpu.memory_space<semaphore_mem>>
    tpu.wait_dma2 semaphore(%326 : memref<!tpu.dma_semaphore, #tpu.memory_space<semaphore_mem>>) src(%323 : memref<1x32xf32, #tpu.memory_space<any>>) dst(%324 : memref<1x32xf32, #tpu.memory_space<vmem>>)
    %c1_i32_303 = arith.constant 1 : i32
    %c9_i32_304 = arith.constant 9 : i32
    %c0_i32_305 = arith.constant 0 : i32
    %327 = tpu.memref_slice %arg2[%180, %c0_i32_305] : memref<5000x32xf32, #tpu.memory_space<any>> -> memref<1x32xf32, #tpu.memory_space<any>>
    %c34_i32_306 = arith.constant 34 : i32
    %c0_i32_307 = arith.constant 0 : i32
    %328 = tpu.memref_slice %arg8[%c34_i32_306, %c0_i32_307] : memref<48x32xf32, #tpu.memory_space<vmem>> -> memref<1x32xf32, #tpu.memory_space<vmem>>
    %329 = tpu.memref_slice %arg9[%c1_i32_303, %c9_i32_304] : memref<2x16x!tpu.dma_semaphore, #tpu.memory_space<semaphore_mem>> -> memref<1x1x!tpu.dma_semaphore, #tpu.memory_space<semaphore_mem>>
    %330 = tpu.memref_squeeze %329 : memref<1x1x!tpu.dma_semaphore, #tpu.memory_space<semaphore_mem>> -> memref<!tpu.dma_semaphore, #tpu.memory_space<semaphore_mem>>
    tpu.wait_dma2 semaphore(%330 : memref<!tpu.dma_semaphore, #tpu.memory_space<semaphore_mem>>) src(%327 : memref<1x32xf32, #tpu.memory_space<any>>) dst(%328 : memref<1x32xf32, #tpu.memory_space<vmem>>)
    %c1_i32_308 = arith.constant 1 : i32
    %c10_i32_309 = arith.constant 10 : i32
    %c0_i32_310 = arith.constant 0 : i32
    %331 = tpu.memref_slice %arg2[%187, %c0_i32_310] : memref<5000x32xf32, #tpu.memory_space<any>> -> memref<1x32xf32, #tpu.memory_space<any>>
    %c35_i32_311 = arith.constant 35 : i32
    %c0_i32_312 = arith.constant 0 : i32
    %332 = tpu.memref_slice %arg8[%c35_i32_311, %c0_i32_312] : memref<48x32xf32, #tpu.memory_space<vmem>> -> memref<1x32xf32, #tpu.memory_space<vmem>>
    %333 = tpu.memref_slice %arg9[%c1_i32_308, %c10_i32_309] : memref<2x16x!tpu.dma_semaphore, #tpu.memory_space<semaphore_mem>> -> memref<1x1x!tpu.dma_semaphore, #tpu.memory_space<semaphore_mem>>
    %334 = tpu.memref_squeeze %333 : memref<1x1x!tpu.dma_semaphore, #tpu.memory_space<semaphore_mem>> -> memref<!tpu.dma_semaphore, #tpu.memory_space<semaphore_mem>>
    tpu.wait_dma2 semaphore(%334 : memref<!tpu.dma_semaphore, #tpu.memory_space<semaphore_mem>>) src(%331 : memref<1x32xf32, #tpu.memory_space<any>>) dst(%332 : memref<1x32xf32, #tpu.memory_space<vmem>>)
    %c1_i32_313 = arith.constant 1 : i32
    %c11_i32_314 = arith.constant 11 : i32
    %c0_i32_315 = arith.constant 0 : i32
    %335 = tpu.memref_slice %arg2[%194, %c0_i32_315] : memref<5000x32xf32, #tpu.memory_space<any>> -> memref<1x32xf32, #tpu.memory_space<any>>
    %c36_i32_316 = arith.constant 36 : i32
    %c0_i32_317 = arith.constant 0 : i32
    %336 = tpu.memref_slice %arg8[%c36_i32_316, %c0_i32_317] : memref<48x32xf32, #tpu.memory_space<vmem>> -> memref<1x32xf32, #tpu.memory_space<vmem>>
    %337 = tpu.memref_slice %arg9[%c1_i32_313, %c11_i32_314] : memref<2x16x!tpu.dma_semaphore, #tpu.memory_space<semaphore_mem>> -> memref<1x1x!tpu.dma_semaphore, #tpu.memory_space<semaphore_mem>>
    %338 = tpu.memref_squeeze %337 : memref<1x1x!tpu.dma_semaphore, #tpu.memory_space<semaphore_mem>> -> memref<!tpu.dma_semaphore, #tpu.memory_space<semaphore_mem>>
    tpu.wait_dma2 semaphore(%338 : memref<!tpu.dma_semaphore, #tpu.memory_space<semaphore_mem>>) src(%335 : memref<1x32xf32, #tpu.memory_space<any>>) dst(%336 : memref<1x32xf32, #tpu.memory_space<vmem>>)
    %c1_i32_318 = arith.constant 1 : i32
    %c12_i32_319 = arith.constant 12 : i32
    %c0_i32_320 = arith.constant 0 : i32
    %339 = tpu.memref_slice %arg2[%201, %c0_i32_320] : memref<5000x32xf32, #tpu.memory_space<any>> -> memref<1x32xf32, #tpu.memory_space<any>>
    %c37_i32_321 = arith.constant 37 : i32
    %c0_i32_322 = arith.constant 0 : i32
    %340 = tpu.memref_slice %arg8[%c37_i32_321, %c0_i32_322] : memref<48x32xf32, #tpu.memory_space<vmem>> -> memref<1x32xf32, #tpu.memory_space<vmem>>
    %341 = tpu.memref_slice %arg9[%c1_i32_318, %c12_i32_319] : memref<2x16x!tpu.dma_semaphore, #tpu.memory_space<semaphore_mem>> -> memref<1x1x!tpu.dma_semaphore, #tpu.memory_space<semaphore_mem>>
    %342 = tpu.memref_squeeze %341 : memref<1x1x!tpu.dma_semaphore, #tpu.memory_space<semaphore_mem>> -> memref<!tpu.dma_semaphore, #tpu.memory_space<semaphore_mem>>
    tpu.wait_dma2 semaphore(%342 : memref<!tpu.dma_semaphore, #tpu.memory_space<semaphore_mem>>) src(%339 : memref<1x32xf32, #tpu.memory_space<any>>) dst(%340 : memref<1x32xf32, #tpu.memory_space<vmem>>)
    %c1_i32_323 = arith.constant 1 : i32
    %c13_i32_324 = arith.constant 13 : i32
    %c0_i32_325 = arith.constant 0 : i32
    %343 = tpu.memref_slice %arg2[%208, %c0_i32_325] : memref<5000x32xf32, #tpu.memory_space<any>> -> memref<1x32xf32, #tpu.memory_space<any>>
    %c38_i32_326 = arith.constant 38 : i32
    %c0_i32_327 = arith.constant 0 : i32
    %344 = tpu.memref_slice %arg8[%c38_i32_326, %c0_i32_327] : memref<48x32xf32, #tpu.memory_space<vmem>> -> memref<1x32xf32, #tpu.memory_space<vmem>>
    %345 = tpu.memref_slice %arg9[%c1_i32_323, %c13_i32_324] : memref<2x16x!tpu.dma_semaphore, #tpu.memory_space<semaphore_mem>> -> memref<1x1x!tpu.dma_semaphore, #tpu.memory_space<semaphore_mem>>
    %346 = tpu.memref_squeeze %345 : memref<1x1x!tpu.dma_semaphore, #tpu.memory_space<semaphore_mem>> -> memref<!tpu.dma_semaphore, #tpu.memory_space<semaphore_mem>>
    tpu.wait_dma2 semaphore(%346 : memref<!tpu.dma_semaphore, #tpu.memory_space<semaphore_mem>>) src(%343 : memref<1x32xf32, #tpu.memory_space<any>>) dst(%344 : memref<1x32xf32, #tpu.memory_space<vmem>>)
    %c1_i32_328 = arith.constant 1 : i32
    %c14_i32_329 = arith.constant 14 : i32
    %c0_i32_330 = arith.constant 0 : i32
    %347 = tpu.memref_slice %arg2[%215, %c0_i32_330] : memref<5000x32xf32, #tpu.memory_space<any>> -> memref<1x32xf32, #tpu.memory_space<any>>
    %c39_i32_331 = arith.constant 39 : i32
    %c0_i32_332 = arith.constant 0 : i32
    %348 = tpu.memref_slice %arg8[%c39_i32_331, %c0_i32_332] : memref<48x32xf32, #tpu.memory_space<vmem>> -> memref<1x32xf32, #tpu.memory_space<vmem>>
    %349 = tpu.memref_slice %arg9[%c1_i32_328, %c14_i32_329] : memref<2x16x!tpu.dma_semaphore, #tpu.memory_space<semaphore_mem>> -> memref<1x1x!tpu.dma_semaphore, #tpu.memory_space<semaphore_mem>>
    %350 = tpu.memref_squeeze %349 : memref<1x1x!tpu.dma_semaphore, #tpu.memory_space<semaphore_mem>> -> memref<!tpu.dma_semaphore, #tpu.memory_space<semaphore_mem>>
    tpu.wait_dma2 semaphore(%350 : memref<!tpu.dma_semaphore, #tpu.memory_space<semaphore_mem>>) src(%347 : memref<1x32xf32, #tpu.memory_space<any>>) dst(%348 : memref<1x32xf32, #tpu.memory_space<vmem>>)
    %c1_i32_333 = arith.constant 1 : i32
    %c15_i32_334 = arith.constant 15 : i32
    %c0_i32_335 = arith.constant 0 : i32
    %351 = tpu.memref_slice %arg2[%222, %c0_i32_335] : memref<5000x32xf32, #tpu.memory_space<any>> -> memref<1x32xf32, #tpu.memory_space<any>>
    %c40_i32_336 = arith.constant 40 : i32
    %c0_i32_337 = arith.constant 0 : i32
    %352 = tpu.memref_slice %arg8[%c40_i32_336, %c0_i32_337] : memref<48x32xf32, #tpu.memory_space<vmem>> -> memref<1x32xf32, #tpu.memory_space<vmem>>
    %353 = tpu.memref_slice %arg9[%c1_i32_333, %c15_i32_334] : memref<2x16x!tpu.dma_semaphore, #tpu.memory_space<semaphore_mem>> -> memref<1x1x!tpu.dma_semaphore, #tpu.memory_space<semaphore_mem>>
    %354 = tpu.memref_squeeze %353 : memref<1x1x!tpu.dma_semaphore, #tpu.memory_space<semaphore_mem>> -> memref<!tpu.dma_semaphore, #tpu.memory_space<semaphore_mem>>
    tpu.wait_dma2 semaphore(%354 : memref<!tpu.dma_semaphore, #tpu.memory_space<semaphore_mem>>) src(%351 : memref<1x32xf32, #tpu.memory_space<any>>) dst(%352 : memref<1x32xf32, #tpu.memory_space<vmem>>)
    %c0_338 = arith.constant 0 : index
    %c0_339 = arith.constant 0 : index
    %355 = vector.load %arg8[%c0_338, %c0_339] : memref<48x32xf32, #tpu.memory_space<vmem>>, vector<24x32xf32>
    %c23_i32 = arith.constant 23 : i32
    %356 = tpu.dynamic_rotate %355 by %c23_i32 dim 0 : vector<24x32xf32>, i32 -> vector<24x32xf32>
    %c22_i32 = arith.constant 22 : i32
    %357 = tpu.dynamic_rotate %355 by %c22_i32 dim 0 : vector<24x32xf32>, i32 -> vector<24x32xf32>
    %358 = tpu.concatenate %355, %356, %357 in 1 : vector<24x32xf32>, vector<24x32xf32>, vector<24x32xf32> -> vector<24x96xf32>
    %c24 = arith.constant 24 : index
    %c0_340 = arith.constant 0 : index
    %359 = vector.load %arg8[%c24, %c0_340] : memref<48x32xf32, #tpu.memory_space<vmem>>, vector<24x32xf32>
    %c23_i32_341 = arith.constant 23 : i32
    %360 = tpu.dynamic_rotate %359 by %c23_i32_341 dim 0 : vector<24x32xf32>, i32 -> vector<24x32xf32>
    %c22_i32_342 = arith.constant 22 : i32
    %361 = tpu.dynamic_rotate %359 by %c22_i32_342 dim 0 : vector<24x32xf32>, i32 -> vector<24x32xf32>
    %362 = tpu.concatenate %359, %360, %361 in 1 : vector<24x32xf32>, vector<24x32xf32>, vector<24x32xf32> -> vector<24x96xf32>
    %363 = tpu.concatenate %358, %362 in 0 : vector<24x96xf32>, vector<24x96xf32> -> vector<48x96xf32>
    %c0_343 = arith.constant 0 : index
    %c0_344 = arith.constant 0 : index
    %364 = vector.load %arg3[%c0_343, %c0_344] : memref<96x64xf32, #tpu.memory_space<vmem>>, vector<96x64xf32>
    %cst_345 = arith.constant dense<0.000000e+00> : vector<48x64xf32>
    %365 = tpu.matmul %363, %364, %cst_345 {dimension_numbers = #tpu.dot_dimension_numbers<[1], [0], [0], [1], [0, 0, 1, 1], [], []>} : vector<48x96xf32>, vector<96x64xf32>, vector<48x64xf32> -> vector<48x64xf32>
    %c0_346 = arith.constant 0 : index
    %c0_347 = arith.constant 0 : index
    %366 = vector.load %arg4[%c0_346, %c0_347] : memref<1x64xf32, #tpu.memory_space<vmem>>, vector<1x64xf32>
    %367 = vector.broadcast %366 : vector<1x64xf32> to vector<48x64xf32>
    %368 = arith.addf %365, %367 : vector<48x64xf32>
    %cst_348 = arith.constant 0.000000e+00 : f32
    %369 = vector.broadcast %cst_348 : f32 to vector<48x64xf32>
    %370 = arith.maximumf %368, %369 : vector<48x64xf32>
    %c47_i32 = arith.constant 47 : i32
    %371 = tpu.dynamic_rotate %370 by %c47_i32 dim 0 : vector<48x64xf32>, i32 -> vector<48x64xf32>
    %372 = arith.maximumf %370, %371 : vector<48x64xf32>
    %373 = vector.shape_cast %372 : vector<48x64xf32> to vector<2x24x64xf32>
    %374 = tpu.iota {dimensions = array<i32: 1>} : vector<2x24x64xi32>
    %c2_i32_349 = arith.constant 2 : i32
    %c0_i32_350 = arith.constant 0 : i32
    %375 = arith.cmpi eq, %c2_i32_349, %c0_i32_350 : i32
    %c1_i32_351 = arith.constant 1 : i32
    %376 = arith.select %375, %c1_i32_351, %c2_i32_349 : i32
    %377 = vector.broadcast %376 : i32 to vector<2x24x64xi32>
    %378 = arith.remsi %374, %377 : vector<2x24x64xi32>
    %c0_i32_352 = arith.constant 0 : i32
    %379 = vector.broadcast %c0_i32_352 : i32 to vector<2x24x64xi32>
    %380 = arith.cmpi ne, %378, %379 : vector<2x24x64xi32>
    %c0_i32_353 = arith.constant 0 : i32
    %381 = vector.broadcast %c0_i32_353 : i32 to vector<2x24x64xi32>
    %382 = arith.cmpi slt, %378, %381 : vector<2x24x64xi32>
    %c0_i32_354 = arith.constant 0 : i32
    %383 = arith.cmpi slt, %376, %c0_i32_354 : i32
    %384 = vector.broadcast %383 : i1 to vector<2x24x64xi1>
    %385 = vector.broadcast %384 : vector<2x24x64xi1> to vector<2x24x64xi1>
    %386 = arith.xori %382, %385 : vector<2x24x64xi1>
    %387 = arith.andi %386, %380 : vector<2x24x64xi1>
    %388 = vector.broadcast %376 : i32 to vector<2x24x64xi32>
    %389 = arith.addi %378, %388 : vector<2x24x64xi32>
    %390 = arith.select %387, %389, %378 : vector<2x24x64xi1>, vector<2x24x64xi32>
    %c0_i32_355 = arith.constant 0 : i32
    %391 = vector.broadcast %c0_i32_355 : i32 to vector<2x24x64xi32>
    %392 = arith.cmpi eq, %390, %391 : vector<2x24x64xi32>
    %c16_i32_356 = arith.constant 16 : i32
    %393 = vector.broadcast %c16_i32_356 : i32 to vector<2x24x64xi32>
    %394 = arith.cmpi slt, %374, %393 : vector<2x24x64xi32>
    %395 = arith.andi %392, %394 : vector<2x24x64xi1>
    %cst_357 = arith.constant 0.000000e+00 : f32
    %396 = vector.broadcast %cst_357 : f32 to vector<2x24x64xf32>
    %397 = arith.select %395, %373, %396 : vector<2x24x64xi1>, vector<2x24x64xf32>
    %cst_358 = arith.constant dense<0.000000e+00> : vector<2x64xf32>
    %398 = vector.multi_reduction <add>, %397, %cst_358 [1] : vector<2x24x64xf32> to vector<2x64xf32>
    %cst_359 = arith.constant 1.250000e-01 : f32
    %399 = vector.broadcast %cst_359 : f32 to vector<2x64xf32>
    %400 = arith.mulf %398, %399 : vector<2x64xf32>
    %c0_360 = arith.constant 0 : index
    %c0_361 = arith.constant 0 : index
    %401 = vector.load %arg5[%c0_360, %c0_361] : memref<1x64xf32, #tpu.memory_space<vmem>>, vector<1x64xf32>
    %402 = vector.broadcast %401 : vector<1x64xf32> to vector<2x64xf32>
    %403 = arith.mulf %400, %402 : vector<2x64xf32>
    %cst_362 = arith.constant dense<0.000000e+00> : vector<2xf32>
    %404 = vector.multi_reduction <add>, %403, %cst_362 [1] : vector<2x64xf32> to vector<2xf32>
    %405 = vector.shape_cast %404 : vector<2xf32> to vector<2x1xf32>
    %c0_363 = arith.constant 0 : index
    %c0_364 = arith.constant 0 : index
    %406 = vector.load %arg6[%c0_363, %c0_364] : memref<1x1xf32, #tpu.memory_space<vmem>>, vector<1x1xf32>
    %407 = vector.broadcast %406 : vector<1x1xf32> to vector<2x1xf32>
    %408 = arith.addf %405, %407 : vector<2x1xf32>
    %409 = arith.negf %408 : vector<2x1xf32>
    %410 = math.exp %409 : vector<2x1xf32>
    %cst_365 = arith.constant 1.000000e+00 : f32
    %411 = vector.broadcast %cst_365 : f32 to vector<2x1xf32>
    %412 = arith.addf %411, %410 : vector<2x1xf32>
    %413 = arith.divf %411, %412 : vector<2x1xf32>
    %c0_366 = arith.constant 0 : index
    %c0_367 = arith.constant 0 : index
    %414 = vector.load %arg7[%c0_366, %c0_367] : memref<2x1xf32, #tpu.memory_space<vmem>>, vector<2x1xf32>
    tpu.vector_store %arg7[%c0_366, %c0_367], %413 {strides = array<i32>} : memref<2x1xf32, #tpu.memory_space<vmem>>, vector<2x1xf32>,
    return
  }
  func.func @transform_1(%arg0: i32, %arg1: memref<2x16xi32, #tpu.memory_space<smem>>) -> (i32, i32) {
    %c0_i32 = arith.constant 0 : i32
    %c0_i32_0 = arith.constant 0 : i32
    %c0_i32_1 = arith.constant 0 : i32
    return %c0_i32, %c0_i32_0 : i32, i32
  }
  func.func @transform_2(%arg0: i32, %arg1: memref<2x16xi32, #tpu.memory_space<smem>>) -> (i32, i32) {
    %c0_i32 = arith.constant 0 : i32
    %c0_i32_0 = arith.constant 0 : i32
    %c0_i32_1 = arith.constant 0 : i32
    return %c0_i32, %c0_i32_0 : i32, i32
  }
  func.func @transform_3(%arg0: i32, %arg1: memref<2x16xi32, #tpu.memory_space<smem>>) -> (i32, i32) {
    %c0_i32 = arith.constant 0 : i32
    %c0_i32_0 = arith.constant 0 : i32
    %c0_i32_1 = arith.constant 0 : i32
    return %c0_i32, %c0_i32_0 : i32, i32
  }
  func.func @transform_4(%arg0: i32, %arg1: memref<2x16xi32, #tpu.memory_space<smem>>) -> (i32, i32) {
    %c0_i32 = arith.constant 0 : i32
    %c0_i32_0 = arith.constant 0 : i32
    %c0_i32_1 = arith.constant 0 : i32
    return %c0_i32, %c0_i32_0 : i32, i32
  }
  func.func @transform_5(%arg0: i32, %arg1: memref<2x16xi32, #tpu.memory_space<smem>>) -> (i32, i32) {
    %c0_i32 = arith.constant 0 : i32
    %c0_i32_0 = arith.constant 0 : i32
    return %arg0, %c0_i32 : i32, i32
  }
}

</mosaic_0001>

<bundles_post_ra>
// kernel: tpu_custom_call.1
= control target key start
LH: loop header
LB: loop body
LE: loop exit
PB: predicated region body
PF: predicated region fallthrough
CT: control target
= control target key end

     0   :  { %s2240_s26 = smov [#allocation5]   ;;  %s2566_s0 = inlined_call_operand.vmem [shape: s32[2,16], index: 0, kind: input, shape index: {}]   ;;  %s2567_s1 = inlined_call_operand.vmem [shape: f32[5000,32], index: 1, kind: input, shape index: {}]   ;;  %s2568_s2 = inlined_call_operand.vmem [shape: f32[96,64], index: 2, kind: input, shape index: {}]   ;;  %s2569_s3 = inlined_call_operand.vmem [shape: f32[1,64], index: 3, kind: input, shape index: {}]   ;;  %s2570_s4 = inlined_call_operand.vmem [shape: f32[1,64], index: 4, kind: input, shape index: {}]   ;;  %s2571_s6 = inlined_call_operand.vmem [shape: f32[2,1], index: 6, kind: output, shape index: {}]   ;;  %s2572_s5 = inlined_call_operand.<no memory space> [shape: f32[1,1], index: 5, kind: input, shape index: {}]  }
   0x1   :  { %s12_s23 = sshll.u32 %s2566_s0, 4  ;;  %v16_v0 = vstv %s2572_s5  ;;  %s13_s23 = int_to_ptr.vmem [resolvable:$true] %s12_s23 }
   0x2   :  { %17 = vst [vmem:[#allocation6] sm:$0x1] %v16_v0  ;;  %15 = dma.vmem_to_smem %s13_s23, 32, %s2240_s26, [#allocation4] }
   0x3   :  { %2174 = dma.done.wait [#allocation4], 32 }
   0x4   :  { %2175 = vsyncadd [#allocation4], 4294967264 }
   0x5   :  { %20 = sfence }
   0x6   :  { %vm30_vm0 = vcmask 261120   ;;  %s38_s27 = sld [smem:[#allocation5]]  ;;  %v2241_v1 = vmov 0.0  }
   0x7   :  { %31 = vst.msk [vmem:[#allocation2] sm:$0xff] %vm30_vm0, %v2241_v1 }
   0x8   :  { %32 = vst.msk [vmem:[#allocation2 + $0x8] sm:$0xff] %vm30_vm0, %v2241_v1 }
   0x9   :  { %33 = vst.msk [vmem:[#allocation2 + $0x10] sm:$0xff] %vm30_vm0, %v2241_v1 }
   0xa   :  { %34 = vst.msk [vmem:[#allocation2 + $0x18] sm:$0xff] %vm30_vm0, %v2241_v1 }
   0xb   :  { %35 = vst.msk [vmem:[#allocation2 + $0x20] sm:$0xff] %vm30_vm0, %v2241_v1 }
   0xc   :  { %36 = vst.msk [vmem:[#allocation2 + $0x28] sm:$0xff] %vm30_vm0, %v2241_v1  ;;  %s39_s28 = scalar_lea.vmem %s2567_s1, %s38_s27 }
   0xd   :  { %v55_v2 = vld [vmem:[%s39_s28] sm:$0x1] }
   0xe   :  { %56 = vst [vmem:[#allocation2 + $0x1] sm:$0x1] %v55_v2 }
   0xf   :  { %74 = vsyncadd [#allocation3], 16  ;;  %s2045_s29 = sld [smem:[#allocation5 + $0x1]] }
  0x15   :  { %s77_s8 = scalar_lea.vmem %s2567_s1, %s2045_s29 }
  0x16   :  { %v94_v3 = vld [vmem:[%s77_s8] sm:$0x1] }
  0x17   :  { %95 = vst [vmem:[#allocation2 + $0x2] sm:$0x1] %v94_v3 }
  0x18   :  { %113 = vsyncadd [#allocation3 + $0x1], 16  ;;  %s2046_s9 = sld [smem:[#allocation5 + $0x2]] }
  0x1e   :  { %s116_s12 = scalar_lea.vmem %s2567_s1, %s2046_s9 }
  0x1f   :  { %v133_v4 = vld [vmem:[%s116_s12] sm:$0x1] }
  0x20   :  { %134 = vst [vmem:[#allocation2 + $0x3] sm:$0x1] %v133_v4 }
  0x21   :  { %152 = vsyncadd [#allocation3 + $0x2], 16  ;;  %s2047_s13 = sld [smem:[#allocation5 + $0x3]] }
  0x27   :  { %s155_s16 = scalar_lea.vmem %s2567_s1, %s2047_s13 }
  0x28   :  { %v172_v5 = vld [vmem:[%s155_s16] sm:$0x1] }
  0x29   :  { %173 = vst [vmem:[#allocation2 + $0x4] sm:$0x1] %v172_v5 }
  0x2a   :  { %191 = vsyncadd [#allocation3 + $0x3], 16  ;;  %s2048_s17 = sld [smem:[#allocation5 + $0x4]] }
  0x30   :  { %s194_s20 = scalar_lea.vmem %s2567_s1, %s2048_s17 }
  0x31   :  { %v211_v6 = vld [vmem:[%s194_s20] sm:$0x1] }
  0x32   :  { %212 = vst [vmem:[#allocation2 + $0x5] sm:$0x1] %v211_v6 }
  0x33   :  { %230 = vsyncadd [#allocation3 + $0x4], 16  ;;  %s2049_s21 = sld [smem:[#allocation5 + $0x5]] }
  0x39   :  { %s233_s24 = scalar_lea.vmem %s2567_s1, %s2049_s21 }
  0x3a   :  { %v250_v7 = vld [vmem:[%s233_s24] sm:$0x1] }
  0x3b   :  { %251 = vst [vmem:[#allocation2 + $0x6] sm:$0x1] %v250_v7 }
  0x3c   :  { %269 = vsyncadd [#allocation3 + $0x5], 16  ;;  %s2050_s25 = sld [smem:[#allocation5 + $0x6]] }
  0x42   :  { %s272_s0 = scalar_lea.vmem %s2567_s1, %s2050_s25 }
  0x43   :  { %v289_v8 = vld [vmem:[%s272_s0] sm:$0x1] }
  0x44   :  { %290 = vst [vmem:[#allocation2 + $0x7] sm:$0x1] %v289_v8 }
  0x45   :  { %308 = vsyncadd [#allocation3 + $0x6], 16  ;;  %s2051_s5 = sld [smem:[#allocation5 + $0x7]] }
  0x4b   :  { %s311_s30 = scalar_lea.vmem %s2567_s1, %s2051_s5 }
  0x4c   :  { %v328_v9 = vld [vmem:[%s311_s30] sm:$0x1] }
  0x4d   :  { %329 = vst [vmem:[#allocation2 + $0x8] sm:$0x1] %v328_v9 }
  0x4e   :  { %347 = vsyncadd [#allocation3 + $0x7], 16  ;;  %s2052_s7 = sld [smem:[#allocation5 + $0x8]] }
  0x54   :  { %s350_s10 = scalar_lea.vmem %s2567_s1, %s2052_s7 }
  0x55   :  { %v367_v10 = vld [vmem:[%s350_s10] sm:$0x1] }
  0x56   :  { %368 = vst [vmem:[#allocation2 + $0x9] sm:$0x1] %v367_v10 }
  0x57   :  { %386 = vsyncadd [#allocation3 + $0x8], 16  ;;  %s2053_s11 = sld [smem:[#allocation5 + $0x9]] }
  0x5d   :  { %s389_s14 = scalar_lea.vmem %s2567_s1, %s2053_s11 }
  0x5e   :  { %v406_v11 = vld [vmem:[%s389_s14] sm:$0x1] }
  0x5f   :  { %407 = vst [vmem:[#allocation2 + $0xa] sm:$0x1] %v406_v11 }
  0x60   :  { %425 = vsyncadd [#allocation3 + $0x9], 16  ;;  %s2054_s15 = sld [smem:[#allocation5 + $0xa]] }
  0x66   :  { %s428_s18 = scalar_lea.vmem %s2567_s1, %s2054_s15 }
  0x67   :  { %v445_v12 = vld [vmem:[%s428_s18] sm:$0x1] }
  0x68   :  { %446 = vst [vmem:[#allocation2 + $0xb] sm:$0x1] %v445_v12 }
  0x69   :  { %464 = vsyncadd [#allocation3 + $0xa], 16  ;;  %s2055_s19 = sld [smem:[#allocation5 + $0xb]] }
  0x6f   :  { %s467_s22 = scalar_lea.vmem %s2567_s1, %s2055_s19 }
  0x70   :  { %v484_v13 = vld [vmem:[%s467_s22] sm:$0x1] }
  0x71   :  { %485 = vst [vmem:[#allocation2 + $0xc] sm:$0x1] %v484_v13 }
  0x72   :  { %503 = vsyncadd [#allocation3 + $0xb], 16  ;;  %s2056_s23 = sld [smem:[#allocation5 + $0xc]] }
  0x78   :  { %s506_s26 = scalar_lea.vmem %s2567_s1, %s2056_s23 }
  0x79   :  { %v523_v14 = vld [vmem:[%s506_s26] sm:$0x1] }
  0x7a   :  { %524 = vst [vmem:[#allocation2 + $0xd] sm:$0x1] %v523_v14 }
  0x7b   :  { %542 = vsyncadd [#allocation3 + $0xc], 16  ;;  %s2057_s27 = sld [smem:[#allocation5 + $0xd]] }
  0x81   :  { %s545_s28 = scalar_lea.vmem %s2567_s1, %s2057_s27 }
  0x82   :  { %v562_v15 = vld [vmem:[%s545_s28] sm:$0x1] }
  0x83   :  { %563 = vst [vmem:[#allocation2 + $0xe] sm:$0x1] %v562_v15 }
  0x84   :  { %581 = vsyncadd [#allocation3 + $0xd], 16  ;;  %s2058_s29 = sld [smem:[#allocation5 + $0xe]] }
  0x8a   :  { %s584_s8 = scalar_lea.vmem %s2567_s1, %s2058_s29 }
  0x8b   :  { %v601_v16 = vld [vmem:[%s584_s8] sm:$0x1] }
  0x8c   :  { %602 = vst [vmem:[#allocation2 + $0xf] sm:$0x1] %v601_v16 }
  0x8d   :  { %620 = vsyncadd [#allocation3 + $0xe], 16  ;;  %s2059_s9 = sld [smem:[#allocation5 + $0xf]] }
  0x93   :  { %s623_s12 = scalar_lea.vmem %s2567_s1, %s2059_s9 }
  0x94   :  { %v640_v17 = vld [vmem:[%s623_s12] sm:$0x1] }
  0x95   :  { %641 = vst [vmem:[#allocation2 + $0x10] sm:$0x1] %v640_v17 }
  0x96   :  { %659 = vsyncadd [#allocation3 + $0xf], 16  ;;  %s2060_s13 = sld [smem:[#allocation5 + $0x80]] }
  0x9c   :  { %s663_s16 = scalar_lea.vmem %s2567_s1, %s2060_s13 }
  0x9d   :  { %v680_v18 = vld [vmem:[%s663_s16] sm:$0x1] }
  0x9e   :  { %681 = vst [vmem:[#allocation2 + $0x19] sm:$0x1] %v680_v18 }
  0x9f   :  { %699 = vsyncadd [#allocation3 + $0x10], 16  ;;  %s2061_s17 = sld [smem:[#allocation5 + $0x81]] }
  0xa5   :  { %s702_s20 = scalar_lea.vmem %s2567_s1, %s2061_s17 }
  0xa6   :  { %v719_v19 = vld [vmem:[%s702_s20] sm:$0x1] }
  0xa7   :  { %720 = vst [vmem:[#allocation2 + $0x1a] sm:$0x1] %v719_v19 }
  0xa8   :  { %738 = vsyncadd [#allocation3 + $0x11], 16  ;;  %s2062_s21 = sld [smem:[#allocation5 + $0x82]] }
  0xae   :  { %s741_s24 = scalar_lea.vmem %s2567_s1, %s2062_s21 }
  0xaf   :  { %v758_v20 = vld [vmem:[%s741_s24] sm:$0x1] }
  0xb0   :  { %759 = vst [vmem:[#allocation2 + $0x1b] sm:$0x1] %v758_v20 }
  0xb1   :  { %777 = vsyncadd [#allocation3 + $0x12], 16  ;;  %s2063_s25 = sld [smem:[#allocation5 + $0x83]] }
  0xb7   :  { %s780_s0 = scalar_lea.vmem %s2567_s1, %s2063_s25 }
  0xb8   :  { %v797_v21 = vld [vmem:[%s780_s0] sm:$0x1] }
  0xb9   :  { %798 = vst [vmem:[#allocation2 + $0x1c] sm:$0x1] %v797_v21 }
  0xba   :  { %816 = vsyncadd [#allocation3 + $0x13], 16  ;;  %s2064_s5 = sld [smem:[#allocation5 + $0x84]] }
  0xc0   :  { %s819_s30 = scalar_lea.vmem %s2567_s1, %s2064_s5 }
  0xc1   :  { %v836_v22 = vld [vmem:[%s819_s30] sm:$0x1] }
  0xc2   :  { %837 = vst [vmem:[#allocation2 + $0x1d] sm:$0x1] %v836_v22 }
  0xc3   :  { %855 = vsyncadd [#allocation3 + $0x14], 16  ;;  %s2065_s7 = sld [smem:[#allocation5 + $0x85]] }
  0xc9   :  { %s858_s10 = scalar_lea.vmem %s2567_s1, %s2065_s7 }
  0xca   :  { %v875_v23 = vld [vmem:[%s858_s10] sm:$0x1] }
  0xcb   :  { %876 = vst [vmem:[#allocation2 + $0x1e] sm:$0x1] %v875_v23 }
  0xcc   :  { %894 = vsyncadd [#allocation3 + $0x15], 16  ;;  %s2066_s11 = sld [smem:[#allocation5 + $0x86]] }
  0xd2   :  { %s897_s14 = scalar_lea.vmem %s2567_s1, %s2066_s11 }
  0xd3   :  { %v914_v24 = vld [vmem:[%s897_s14] sm:$0x1] }
  0xd4   :  { %915 = vst [vmem:[#allocation2 + $0x1f] sm:$0x1] %v914_v24 }
  0xd5   :  { %933 = vsyncadd [#allocation3 + $0x16], 16  ;;  %s2067_s15 = sld [smem:[#allocation5 + $0x87]] }
  0xdb   :  { %s936_s18 = scalar_lea.vmem %s2567_s1, %s2067_s15 }
  0xdc   :  { %v953_v25 = vld [vmem:[%s936_s18] sm:$0x1] }
  0xdd   :  { %954 = vst [vmem:[#allocation2 + $0x20] sm:$0x1] %v953_v25 }
  0xde   :  { %972 = vsyncadd [#allocation3 + $0x17], 16  ;;  %s2068_s19 = sld [smem:[#allocation5 + $0x88]] }
  0xe4   :  { %s975_s22 = scalar_lea.vmem %s2567_s1, %s2068_s19 }
  0xe5   :  { %v992_v26 = vld [vmem:[%s975_s22] sm:$0x1] }
  0xe6   :  { %993 = vst [vmem:[#allocation2 + $0x21] sm:$0x1] %v992_v26 }
  0xe7   :  { %1011 = vsyncadd [#allocation3 + $0x18], 16  ;;  %s2069_s23 = sld [smem:[#allocation5 + $0x89]] }
  0xed   :  { %s1014_s26 = scalar_lea.vmem %s2567_s1, %s2069_s23 }
  0xee   :  { %v1031_v27 = vld [vmem:[%s1014_s26] sm:$0x1] }
  0xef   :  { %1032 = vst [vmem:[#allocation2 + $0x22] sm:$0x1] %v1031_v27 }
  0xf0   :  { %1050 = vsyncadd [#allocation3 + $0x19], 16  ;;  %s2070_s27 = sld [smem:[#allocation5 + $0x8a]] }
  0xf6   :  { %s1053_s28 = scalar_lea.vmem %s2567_s1, %s2070_s27 }
  0xf7   :  { %v1070_v28 = vld [vmem:[%s1053_s28] sm:$0x1] }
  0xf8   :  { %1071 = vst [vmem:[#allocation2 + $0x23] sm:$0x1] %v1070_v28 }
  0xf9   :  { %1089 = vsyncadd [#allocation3 + $0x1a], 16  ;;  %s2071_s29 = sld [smem:[#allocation5 + $0x8b]] }
  0xff   :  { %s1092_s8 = scalar_lea.vmem %s2567_s1, %s2071_s29 }
 0x100   :  { %v1109_v29 = vld [vmem:[%s1092_s8] sm:$0x1] }
 0x101   :  { %1110 = vst [vmem:[#allocation2 + $0x24] sm:$0x1] %v1109_v29 }
 0x102   :  { %1128 = vsyncadd [#allocation3 + $0x1b], 16  ;;  %s2072_s9 = sld [smem:[#allocation5 + $0x8c]] }
 0x108   :  { %s1131_s12 = scalar_lea.vmem %s2567_s1, %s2072_s9 }
 0x109   :  { %v1148_v30 = vld [vmem:[%s1131_s12] sm:$0x1] }
 0x10a   :  { %1149 = vst [vmem:[#allocation2 + $0x25] sm:$0x1] %v1148_v30 }
 0x10b   :  { %1167 = vsyncadd [#allocation3 + $0x1c], 16  ;;  %s2073_s13 = sld [smem:[#allocation5 + $0x8d]] }
 0x111   :  { %s1170_s16 = scalar_lea.vmem %s2567_s1, %s2073_s13 }
 0x112   :  { %v1187_v31 = vld [vmem:[%s1170_s16] sm:$0x1] }
 0x113   :  { %1188 = vst [vmem:[#allocation2 + $0x26] sm:$0x1] %v1187_v31 }
 0x114   :  { %1206 = vsyncadd [#allocation3 + $0x1d], 16  ;;  %s2074_s17 = sld [smem:[#allocation5 + $0x8e]] }
 0x11a   :  { %s1209_s20 = scalar_lea.vmem %s2567_s1, %s2074_s17 }
 0x11b   :  { %v1226_v32 = vld [vmem:[%s1209_s20] sm:$0x1] }
 0x11c   :  { %1227 = vst [vmem:[#allocation2 + $0x27] sm:$0x1] %v1226_v32 }
 0x11d   :  { %1245 = vsyncadd [#allocation3 + $0x1e], 16  ;;  %s2075_s21 = sld [smem:[#allocation5 + $0x8f]] }
 0x123   :  { %s1248_s24 = scalar_lea.vmem %s2567_s1, %s2075_s21 }
 0x124   :  { %v1265_v33 = vld [vmem:[%s1248_s24] sm:$0x1] }
 0x125   :  { %1266 = vst [vmem:[#allocation2 + $0x28] sm:$0x1] %v1265_v33 }
 0x126   :  { %1284 = vsyncadd [#allocation3 + $0x1f], 16 }
 0x127   :  { %2176 = dma.done.wait [#allocation3], 16 }
 0x128   :  { %2177 = vsyncadd [#allocation3], 4294967280 }
 0x129   :  { %2178 = dma.done.wait [#allocation3 + $0x1], 16 }
 0x12a   :  { %2179 = vsyncadd [#allocation3 + $0x1], 4294967280 }
 0x12b   :  { %2180 = dma.done.wait [#allocation3 + $0x2], 16 }
 0x12c   :  { %2181 = vsyncadd [#allocation3 + $0x2], 4294967280 }
 0x12d   :  { %2182 = dma.done.wait [#allocation3 + $0x3], 16 }
 0x12e   :  { %2183 = vsyncadd [#allocation3 + $0x3], 4294967280 }
 0x12f   :  { %2184 = dma.done.wait [#allocation3 + $0x4], 16 }
 0x130   :  { %2185 = vsyncadd [#allocation3 + $0x4], 4294967280 }
 0x131   :  { %2186 = dma.done.wait [#allocation3 + $0x5], 16 }
 0x132   :  { %2187 = vsyncadd [#allocation3 + $0x5], 4294967280 }
 0x133   :  { %2188 = dma.done.wait [#allocation3 + $0x6], 16 }
 0x134   :  { %2189 = vsyncadd [#allocation3 + $0x6], 4294967280 }
 0x135   :  { %2190 = dma.done.wait [#allocation3 + $0x7], 16 }
 0x136   :  { %2191 = vsyncadd [#allocation3 + $0x7], 4294967280 }
 0x137   :  { %2192 = dma.done.wait [#allocation3 + $0x8], 16 }
 0x138   :  { %2193 = vsyncadd [#allocation3 + $0x8], 4294967280 }
 0x139   :  { %2194 = dma.done.wait [#allocation3 + $0x9], 16 }
 0x13a   :  { %2195 = vsyncadd [#allocation3 + $0x9], 4294967280 }
 0x13b   :  { %2196 = dma.done.wait [#allocation3 + $0xa], 16 }
 0x13c   :  { %2197 = vsyncadd [#allocation3 + $0xa], 4294967280 }
 0x13d   :  { %2198 = dma.done.wait [#allocation3 + $0xb], 16 }
 0x13e   :  { %2199 = vsyncadd [#allocation3 + $0xb], 4294967280 }
 0x13f   :  { %2200 = dma.done.wait [#allocation3 + $0xc], 16 }
 0x140   :  { %2201 = vsyncadd [#allocation3 + $0xc], 4294967280 }
 0x141   :  { %2202 = dma.done.wait [#allocation3 + $0xd], 16 }
 0x142   :  { %2203 = vsyncadd [#allocation3 + $0xd], 4294967280 }
 0x143   :  { %2204 = dma.done.wait [#allocation3 + $0xe], 16 }
 0x144   :  { %2205 = vsyncadd [#allocation3 + $0xe], 4294967280 }
 0x145   :  { %2206 = dma.done.wait [#allocation3 + $0xf], 16 }
 0x146   :  { %2207 = vsyncadd [#allocation3 + $0xf], 4294967280 }
 0x147   :  { %2208 = dma.done.wait [#allocation3 + $0x10], 16 }
 0x148   :  { %2209 = vsyncadd [#allocation3 + $0x10], 4294967280 }
 0x149   :  { %2210 = dma.done.wait [#allocation3 + $0x11], 16 }
 0x14a   :  { %2211 = vsyncadd [#allocation3 + $0x11], 4294967280 }
 0x14b   :  { %2212 = dma.done.wait [#allocation3 + $0x12], 16 }
 0x14c   :  { %2213 = vsyncadd [#allocation3 + $0x12], 4294967280 }
 0x14d   :  { %2214 = dma.done.wait [#allocation3 + $0x13], 16 }
 0x14e   :  { %2215 = vsyncadd [#allocation3 + $0x13], 4294967280 }
 0x14f   :  { %2216 = dma.done.wait [#allocation3 + $0x14], 16 }
 0x150   :  { %2217 = vsyncadd [#allocation3 + $0x14], 4294967280 }
 0x151   :  { %2218 = dma.done.wait [#allocation3 + $0x15], 16 }
 0x152   :  { %2219 = vsyncadd [#allocation3 + $0x15], 4294967280 }
 0x153   :  { %2220 = dma.done.wait [#allocation3 + $0x16], 16 }
 0x154   :  { %2221 = vsyncadd [#allocation3 + $0x16], 4294967280 }
 0x155   :  { %2222 = dma.done.wait [#allocation3 + $0x17], 16 }
 0x156   :  { %2223 = vsyncadd [#allocation3 + $0x17], 4294967280 }
 0x157   :  { %2224 = dma.done.wait [#allocation3 + $0x18], 16 }
 0x158   :  { %2225 = vsyncadd [#allocation3 + $0x18], 4294967280 }
 0x159   :  { %2226 = dma.done.wait [#allocation3 + $0x19], 16 }
 0x15a   :  { %2227 = vsyncadd [#allocation3 + $0x19], 4294967280 }
 0x15b   :  { %2228 = dma.done.wait [#allocation3 + $0x1a], 16 }
 0x15c   :  { %2229 = vsyncadd [#allocation3 + $0x1a], 4294967280 }
 0x15d   :  { %2230 = dma.done.wait [#allocation3 + $0x1b], 16 }
 0x15e   :  { %2231 = vsyncadd [#allocation3 + $0x1b], 4294967280 }
 0x15f   :  { %2232 = dma.done.wait [#allocation3 + $0x1c], 16 }
 0x160   :  { %2233 = vsyncadd [#allocation3 + $0x1c], 4294967280 }
 0x161   :  { %2234 = dma.done.wait [#allocation3 + $0x1d], 16 }
 0x162   :  { %2235 = vsyncadd [#allocation3 + $0x1d], 4294967280 }
 0x163   :  { %2236 = dma.done.wait [#allocation3 + $0x1e], 16 }
 0x164   :  { %2237 = vsyncadd [#allocation3 + $0x1e], 4294967280 }
 0x165   :  { %2238 = dma.done.wait [#allocation3 + $0x1f], 16 }
 0x166   :  { %2239 = vsyncadd [#allocation3 + $0x1f], 4294967280  ;;  %v1356_v34 = vlaneseq  ;;  %v2389_v36 = vld [vmem:[#allocation2] sm:$0xff]  ;;  %v2391_v37 = vld [vmem:[#allocation2 + $0x10] sm:$0xff]  ;;  %s2242_s0 = smov 64   ;;  %s2243_s5 = smov 32  }
 0x167   :  { %v1362_v38 = vrot.slane %v2389_v36, 2  ;;  %v1364_v39 = vrot.slane %v2391_v37, 2  ;;  %v1353_v40 = vrot.slane %v2389_v36, 1  ;;  %v1355_v41 = vrot.slane %v2391_v37, 1  ;;  %v2399_v42 = vld [vmem:[#allocation2 + $0x20] sm:$0xff]  ;;  %v2401_v43 = vld [vmem:[#allocation2 + $0x28] sm:$0xff] }
 0x168   :  { %v2387_v35 = vshrl.u32 %v1356_v34, 7  ;;  %v1456_v44 = vld [vmem:[%s2568_s2 + $0x58] sm:$0xff]  ;;  %v1455_v48 = vld [vmem:[%s2568_s2 + $0x50] sm:$0xff]  ;;  %v1404_v49 = vrot.slane %v2399_v42, 1  ;;  %v1454_v51 = vld [vmem:[%s2568_s2 + $0x48] sm:$0xff]  ;;  %v1410_v52 = vrot.slane %v2399_v42, 2 }
 0x169   :  { %v2418_v47 = vld [vmem:[#allocation2 + $0x18] sm:$0xff]  ;;  %2116 = vmatpush.msra.mxu2 %v1456_v44  ;;  %2117 = vmatpush.msra.mxu3 %v1456_v44  ;;  %v1411_v53 = vrot.slane %v2401_v43, 2  ;;  %v1405_v54 = vrot.slane %v2401_v43, 1  ;;  %v1453_v56 = vld [vmem:[%s2568_s2 + $0x40] sm:$0xff]  ;;  %v1451_v60 = vld [vmem:[%s2568_s2 + $0x30] sm:$0xff]  ;;  %vm1396_vm3 = vcmask 523264  }
 0x16a   :  { %vm1365_vm1 = vcmp.lt.s32.totalorder %v2387_v35, 6  ;;  %vm1358_vm2 = vcmp.lt.s32.totalorder %v2387_v35, 7  ;;  %v1403_v50 = vrot.slane %v2418_v47, 1  ;;  %v1452_v57 = vld [vmem:[%s2568_s2 + $0x38] sm:$0xff]  ;;  %1484 = vmatpush.msra.mxu0 %v1456_v44  ;;  %2115 = vmatpush.msra.mxu1 %v1456_v44  ;;  %v1450_v62 = vld [vmem:[%s2568_s2 + $0x28] sm:$0xff]  ;;  %v1409_v63 = vrot.slane %v2418_v47, 2 }
 0x16b   :  { %v1368_v45 = vsel %vm1365_vm1, %v1364_v39, %v1362_v38  ;;  %v1361_v46 = vsel %vm1358_vm2, %v1355_v41, %v1353_v40  ;;  %2119 = vmatpush.msra.mxu2 %v1455_v48  ;;  %2120 = vmatpush.msra.mxu3 %v1455_v48  ;;  %v1412_v58 = vsel %vm1365_vm1, %v1410_v52, %v1411_v53  ;;  %v1449_v0 = vld [vmem:[%s2568_s2 + $0x20] sm:$0xff]  ;;  %v2460_v1 = vld [vmem:[#allocation2 + $0x8] sm:$0xff]  ;;  %v1448_v2 = vld [vmem:[%s2568_s2 + $0x18] sm:$0xff]  ;;  %vm1461_vm4 = vcmask 785408  }
 0x16c   :  { %1388 = vrot.lane.b32.xlu1 %v1368_v45, %s2242_s0  ;;  %1376 = vrot.lane.b32.xlu0 %v1361_v46, %s2243_s5  ;;  %v1407_v55 = vsel %vm1358_vm2, %v1403_v50, %v1404_v49  ;;  %v1406_v59 = vsel %vm1358_vm2, %v1404_v49, %v1405_v54  ;;  %v1408_v61 = vsel %vm1358_vm2, %v1405_v54, %v1403_v50  ;;  %v1354_v5 = vrot.slane %v2460_v1, 1  ;;  %v1447_v6 = vld [vmem:[%s2568_s2 + $0x10] sm:$0xff]  ;;  %v1446_v8 = vld [vmem:[%s2568_s2 + $0x8] sm:$0xff] }
 0x16d   :  { %1418 = vrot.lane.b32.xlu2 %v1407_v55, %s2243_s5  ;;  %2122 = vmatpush.msra.mxu2 %v1454_v51  ;;  %v1414_v3 = vsel %vm1365_vm1, %v1411_v53, %v1409_v63  ;;  %v1413_v4 = vsel %vm1365_vm1, %v1409_v63, %v1410_v52  ;;  %v1363_v9 = vrot.slane %v2460_v1, 2  ;;  %v1445_v13 = vld [vmem:[%s2568_s2] sm:$0xff]  ;;  %v1545_v52 = vand.u32 1, %v2387_v35 }
 0x16e   :  { %2123 = vmatpush.msra.mxu3 %v1454_v51  ;;  %1485 = vmatpush.msra.mxu0 %v1455_v48  ;;  %v1360_v7 = vsel %vm1358_vm2, %v1353_v40, %v1354_v5  ;;  %v1359_v11 = vsel %vm1358_vm2, %v1354_v5, %v1355_v41  ;;  %vm1625_vm7 = vcmask 1041409   ;;  %vm1628_vm8 = vcmask 517120  }
 0x16f   :  { %2125 = vmatpush.msra.mxu2 %v1453_v56  ;;  %2118 = vmatpush.msra.mxu1 %v1455_v48  ;;  %v1367_v10 = vsel %vm1365_vm1, %v1362_v38, %v1363_v9  ;;  %v1366_v12 = vsel %vm1365_vm1, %v1363_v9, %v1364_v39  ;;  %vm2534_vm5 = vcmp.eq.s32.totalorder %v1545_v52, 0  ;;  %vm1656_vm11 = vcmask 1024  }
 0x170   :  { %2126 = vmatpush.msra.mxu3 %v1453_v56  ;;  %1486 = vmatpush.msra.mxu0 %v1454_v51 }
 0x171   :  { %2128 = vmatpush.msra.mxu2 %v1452_v57  ;;  %2121 = vmatpush.msra.mxu1 %v1454_v51 }
 0x172   :  { %2129 = vmatpush.msra.mxu3 %v1452_v57  ;;  %1487 = vmatpush.msra.mxu0 %v1453_v56 }
 0x173   :  { %2131 = vmatpush.msra.mxu2 %v1451_v60  ;;  %2124 = vmatpush.msra.mxu1 %v1453_v56 }
 0x174   :  { %1432 = vrot.lane.b32.xlu1 %v1412_v58, %s2242_s0  ;;  %1420 = vrot.lane.b32.xlu0 %v1406_v59, %s2243_s5 }
 0x175   :  { %1422 = vrot.lane.b32.xlu2 %v1408_v61, %s2243_s5  ;;  %2134 = vmatpush.msra.mxu2 %v1450_v62 }
 0x176   :  { %2132 = vmatpush.msra.mxu3 %v1451_v60  ;;  %1488 = vmatpush.msra.mxu0 %v1452_v57 }
 0x177   :  { %2137 = vmatpush.msra.mxu2 %v1449_v0  ;;  %2127 = vmatpush.msra.mxu1 %v1452_v57 }
 0x178   :  { %2135 = vmatpush.msra.mxu3 %v1450_v62  ;;  %1489 = vmatpush.msra.mxu0 %v1451_v60 }
 0x179   :  { %2140 = vmatpush.msra.mxu2 %v1448_v2  ;;  %2130 = vmatpush.msra.mxu1 %v1451_v60 }
 0x17a   :  { %2138 = vmatpush.msra.mxu3 %v1449_v0  ;;  %1490 = vmatpush.msra.mxu0 %v1450_v62 }
 0x17b   :  { %2143 = vmatpush.msra.mxu2 %v1447_v6  ;;  %2133 = vmatpush.msra.mxu1 %v1450_v62 }
 0x17c   :  { %1434 = vrot.lane.b32.xlu1 %v1414_v3, %s2242_s0  ;;  %1430 = vrot.lane.b32.xlu0 %v1413_v4, %s2242_s0 }
 0x17d   :  { %1372 = vrot.lane.b32.xlu2 %v1360_v7, %s2243_s5  ;;  %2146 = vmatpush.msra.mxu2 %v1446_v8 }
 0x17e   :  { %2141 = vmatpush.msra.mxu3 %v1448_v2  ;;  %1491 = vmatpush.msra.mxu0 %v1449_v0 }
 0x17f   :  { %2136 = vmatpush.msra.mxu1 %v1449_v0  ;;  %2149 = vmatpush.msra.mxu2 %v1445_v13 }
 0x180   :  { %2144 = vmatpush.msra.mxu3 %v1447_v6  ;;  %1492 = vmatpush.msra.mxu0 %v1448_v2 }
 0x181   :  { %2139 = vmatpush.msra.mxu1 %v1448_v2 }
 0x182   :  { %2147 = vmatpush.msra.mxu3 %v1446_v8  ;;  %1493 = vmatpush.msra.mxu0 %v1447_v6 }
 0x183   :  { %2142 = vmatpush.msra.mxu1 %v1447_v6 }
 0x184   :  { %1384 = vrot.lane.b32.xlu1 %v1367_v10, %s2242_s0  ;;  %1374 = vrot.lane.b32.xlu0 %v1359_v11, %s2243_s5 }
 0x185   :  { %1386 = vrot.lane.b32.xlu2 %v1366_v12, %s2242_s0  ;;  %1494 = vmatpush.msra.mxu0 %v1446_v8 }
 0x186   :  { %2145 = vmatpush.msra.mxu1 %v1446_v8  ;;  %2150 = vmatpush.msra.mxu3 %v1445_v13 }
 0x187   :  { %1495 = vmatpush.msra.mxu0 %v1445_v13 }
 0x188   :  { %2148 = vmatpush.msra.mxu1 %v1445_v13 }
 0x1c7   :  { %v1419_v14 = vpop.permute.xlu2 %1418 }
 0x1c8   :  { %v1439_v25 = vsel %vm30_vm0, %v2418_v47, %v1419_v14 }
 0x1cf   :  { %v1423_v19 = vpop.permute.xlu2 %1422 }
 0x1d0   :  { %v1441_v26 = vsel %vm30_vm0, %v2401_v43, %v1423_v19  ;;  %v1539_v43 = vadd.s32 8, %v2387_v35 }
 0x1d2   :  { %v1552_v55 = vand.u32 1, %v1539_v43  ;;  %v2157_v43 = vld [vmem:[#allocation6] ss:$0 sm:$0xff] }
 0x1d4   :  { %vm2538_vm6 = vcmp.eq.s32.totalorder %v1552_v55, 0 }
 0x1d7   :  { %v1373_v24 = vpop.permute.xlu2 %1372 }
 0x1d8   :  { %v1393_v32 = vsel %vm30_vm0, %v2389_v36, %v1373_v24 }
 0x1de   :  { %v1389_v15 = vpop.permute.xlu1 %1388  ;;  %v1377_v16 = vpop.permute.xlu0 %1376 }
 0x1df   :  { %v1395_v17 = vsel %vm30_vm0, %v2391_v37, %v1377_v16  ;;  %v1387_v31 = vpop.permute.xlu2 %1386 }
 0x1e0   :  { %v1399_v18 = vsel %vm1396_vm3, %v1395_v17, %v1389_v15 }
 0x1e1   :  { %2078 = vmatmul.msk.f32.vlgmr.msra.gmra.mxu2 %vm1461_vm4, %v1399_v18 }
 0x1e6   :  { %v1433_v20 = vpop.permute.xlu1 %1432  ;;  %v1421_v21 = vpop.permute.xlu0 %1420 }
 0x1e7   :  { %v1440_v22 = vsel %vm30_vm0, %v2399_v42, %v1421_v21  ;;  %v2155_v42 = vld [vmem:[%s2569_s3] ss:$0 sm:$0xff] }
 0x1e8   :  { %v1443_v23 = vsel %vm1396_vm3, %v1440_v22, %v1433_v20 }
 0x1e9   :  { %2080 = vmatmul.msk.f32.vlgmr.msra.gmra.mxu3 %vm1461_vm4, %v1443_v23 }
 0x1ee   :  { %v1435_v27 = vpop.permute.xlu1 %1434  ;;  %v1431_v28 = vpop.permute.xlu0 %1430 }
 0x1ef   :  { %v1442_v29 = vsel %vm1396_vm3, %v1439_v25, %v1431_v28  ;;  %v1444_v30 = vsel %vm1396_vm3, %v1441_v26, %v1435_v27 }
 0x1f0   :  { %2079 = vmatmul.msk.f32.gmra.mxu2 %vm1461_vm4, %v1442_v29 }
 0x1f1   :  { %2081 = vmatmul.msk.f32.gmra.mxu3 %vm1461_vm4, %v1444_v30 }
 0x1f6   :  { %v1385_v33 = vpop.permute.xlu1 %1384  ;;  %v1375_v34 = vpop.permute.xlu0 %1374 }
 0x1f7   :  { %v1394_v37 = vsel %vm30_vm0, %v2460_v1, %v1375_v34  ;;  %v1397_v38 = vsel %vm1396_vm3, %v1393_v32, %v1385_v33  ;;  %v2156_v33 = vld [vmem:[%s2570_s4] ss:$0 sm:$0xff] }
 0x1f8   :  { %2076 = vmatmul.msk.f32.vlgmr.msra.gmra.mxu0 %vm1461_vm4, %v1397_v38  ;;  %v1398_v39 = vsel %vm1396_vm3, %v1394_v37, %v1387_v31 }
 0x1f9   :  { %2077 = vmatmul.msk.f32.vlgmr.msra.gmra.mxu1 %vm1461_vm4, %v1398_v39 }
 0x264   :  { %v1503_v40 = vpop.f32.mrf.mxu2 }
 0x265   :  { %v1504_v44 = vadd.f32 %v2155_v42, %v1503_v40 }
 0x267   :  { %v1517_v56 = vmax.f32 %v1504_v44, 0.0 }
 0x269   :  { %v1523_v4 = vrot.slane %v1517_v56, 1 }
 0x26c   :  { %v1509_v41 = vpop.f32.mrf.mxu3 }
 0x26d   :  { %v1510_v36 = vadd.f32 %v2155_v42, %v1509_v41 }
 0x26f   :  { %v1519_v46 = vmax.f32 %v1510_v36, 0.0 }
 0x271   :  { %v1525_v59 = vrot.slane %v1519_v46, 1 }
 0x273   :  { %v1506_v45 = vpop.f32.mrf.mxu2 }
 0x274   :  { %v1507_v47 = vadd.f32 %v2155_v42, %v1506_v45  ;;  %v1512_v48 = vpop.f32.mrf.mxu3 }
 0x275   :  { %v1513_v49 = vadd.f32 %v2155_v42, %v1512_v48  ;;  %v1497_v50 = vpop.f32.mrf.mxu0 }
 0x276   :  { %v1518_v51 = vmax.f32 %v1507_v47, 0.0  ;;  %v1498_v53 = vadd.f32 %v2155_v42, %v1497_v50  ;;  %v1500_v54 = vpop.f32.mrf.mxu1 }
 0x277   :  { %v1520_v57 = vmax.f32 %v1513_v49, 0.0  ;;  %v1501_v58 = vadd.f32 %v2155_v42, %v1500_v54 }
 0x278   :  { %v1524_v60 = vrot.slane %v1518_v51, 1  ;;  %v1515_v61 = vmax.f32 %v1498_v53, 0.0 }
 0x279   :  { %v1526_v62 = vrot.slane %v1520_v57, 1  ;;  %v1516_v63 = vmax.f32 %v1501_v58, 0.0 }
 0x27a   :  { %v1528_v0 = vsel %vm1358_vm2, %v1524_v60, %v1525_v59  ;;  %v1521_v2 = vrot.slane %v1515_v61, 1 }
 0x27b   :  { %v1536_v5 = vmax.f32 %v1518_v51, %v1528_v0  ;;  %v1527_v6 = vsel %vm1358_vm2, %v1525_v59, %v1526_v62  ;;  %v1522_v7 = vrot.slane %v1516_v63, 1 }
 0x27c   :  { %v1537_v8 = vmax.f32 %v1519_v46, %v1527_v6 }
 0x27d   :  { %v1589_v9 = vsel %vm2534_vm5, %v1536_v5, 0.0  ;;  %v1530_v10 = vsel %vm1358_vm2, %v1522_v7, %v1523_v4  ;;  %v1531_v11 = vsel %vm1358_vm2, %v1521_v2, %v1522_v7 }
 0x27e   :  { %v1603_v12 = vsel %vm1396_vm3, %v1589_v9, 0.0  ;;  %v1533_v13 = vmax.f32 %v1515_v61, %v1531_v11  ;;  %v1534_v14 = vmax.f32 %v1516_v63, %v1530_v10  ;;  %v1590_v15 = vsel %vm2538_vm6, %v1537_v8, 0.0 }
 0x27f   :  { %v1604_v16 = vsel %vm1396_vm3, %v1590_v15, 0.0 }
 0x280   :  { %v1586_v17 = vsel %vm2534_vm5, %v1533_v13, 0.0  ;;  %v1587_v18 = vsel %vm2538_vm6, %v1534_v14, 0.0  ;;  %v1605_v19 = vadd.f32 %v1604_v16, %v1603_v12 }
 0x281   :  { %v1592_v20 = vsel %vm1396_vm3, %v1586_v17, 0.0  ;;  %v1593_v35 = vsel %vm1396_vm3, %v1587_v18, 0.0 }
 0x282   :  { %v1594_v21 = vadd.f32 %v1593_v35, %v1592_v20  ;;  %v1608_v22 = vrot.slane %v1605_v19, 4 }
 0x284   :  { %v1597_v23 = vrot.slane %v1594_v21, 4  ;;  %v1609_v24 = vadd.f32 %v1608_v22, %v1605_v19 }
 0x286   :  { %v1598_v25 = vadd.f32 %v1597_v23, %v1594_v21  ;;  %v1610_v26 = vrot.slane %v1609_v24, 2 }
 0x288   :  { %v1599_v27 = vrot.slane %v1598_v25, 2  ;;  %v1611_v28 = vadd.f32 %v1610_v26, %v1609_v24 }
 0x28a   :  { %v1600_v29 = vadd.f32 %v1599_v27, %v1598_v25  ;;  %v1612_v30 = vrot.slane %v1611_v28, 1 }
 0x28c   :  { %v1601_v31 = vrot.slane %v1600_v29, 1  ;;  %v1613_v32 = vadd.f32 %v1612_v30, %v1611_v28 }
 0x28e   :  { %v1602_v34 = vadd.f32 %v1601_v31, %v1600_v29  ;;  %v1615_v37 = vmul.f32 0.125, %v1613_v32 }
 0x290   :  { %v1614_v38 = vmul.f32 0.125, %v1602_v34  ;;  %v1621_v39 = vmul.f32 %v2156_v33, %v1615_v37 }
 0x292   :  { %v1620_v40 = vmul.f32 %v2156_v33, %v1614_v38  ;;  %v1624_v41 = vrot.slane %v1621_v39, 7 }
 0x294   :  { %v1626_v42 = vsel %vm1625_vm7, %v1624_v41, %v1620_v40 }
 0x295   :  { %v1629_v36 = vsel %vm1628_vm8, %v1626_v42, 0.0 }
 0x296   :  { %1630 = vadd.xlane.f32.xlu0 %v1629_v36 }
 0x309   :  { %v1631_v44 = vpop.xlane.xlu0 %1630 }
 0x30a   :  { %v1636_v45 = vadd.f32 %v2157_v43, %v1631_v44 }
 0x30c   :  { %v2082_v46 = vmul.f32 -1.442695, %v1636_v45 }
 0x30e   :  { %2158 = vpow2.f32 %v2082_v46 }
 0x314   :  { %v2159_v47 = vpop.eup %2158 }
 0x315   :  { %v1640_v48 = vadd.f32 1.0, %v2159_v47 }
 0x317   :  { %2160 = vrcp.f32 %v1640_v48  ;;  %v1652_v52 = vand.u32 2147483648, %v1640_v48  ;;  %v1650_v54 = vand.u32 2147483647, %v1640_v48  ;;  %vm1646_vm10 = vweird.f32 %v1640_v48 }
 0x319   :  { %v1653_v56 = vor.u32 1.1754944e-38, %v1652_v52  ;;  %vm1651_vm13 = vcmp.eq.f32.partialorder %v1650_v54, 8.507059e+37 }
 0x31d   :  { %v2161_v49 = vpop.eup %2160 }
 0x31e   :  { %v1642_v50 = vmul.f32 %v2161_v49, %v1640_v48  ;;  %vm1647_vm9 = vweird.f32 %v2161_v49 }
 0x31f   :  { %vm1648_vm12 = vmor %vm1646_vm10, %vm1647_vm9 }
 0x320   :  { %v1643_v51 = vsub.f32 1.0, %v1642_v50 }
 0x322   :  { %v1644_v53 = vmul.f32 %v2161_v49, %v1643_v51 }
 0x324   :  { %v1645_v55 = vadd.f32 %v2161_v49, %v1644_v53 }
 0x326   :  { %v1649_v57 = vsel %vm1648_vm12, %v2161_v49, %v1645_v55 }
 0x327   :  { %v1654_v58 = vsel %vm1651_vm13, %v1653_v56, %v1649_v57 }
 0x328   :  { %1657 = vst.msk [vmem:[%s2571_s6] sm:$0x3] %vm1656_vm11, %v1654_v58 }
 0x329   :  { %1662 = vsyncmov [#allocation3] }
 0x32c   :  { %s1663_s26 = vpop.sfrf %1662 }
 0x32d   :  { %p2083_p0 = scmp.ne.s32.totalorder %s1663_s26, 0 }
 0x32f   :  { %1667 = shalt.err (%p2083_p0)  }
 0x330   :  { %1669 = vsyncmov [#allocation3 + $0x1] }
 0x333   :  { %s1670_s27 = vpop.sfrf %1669 }
 0x334   :  { %p2084_p1 = scmp.ne.s32.totalorder %s1670_s27, 0 }
 0x336   :  { %1674 = shalt.err (%p2084_p1)  }
 0x337   :  { %1676 = vsyncmov [#allocation3 + $0x2] }
 0x33a   :  { %s1677_s0 = vpop.sfrf %1676 }
 0x33b   :  { %p2085_p2 = scmp.ne.s32.totalorder %s1677_s0, 0 }
 0x33d   :  { %1681 = shalt.err (%p2085_p2)  }
 0x33e   :  { %1683 = vsyncmov [#allocation3 + $0x3] }
 0x341   :  { %s1684_s5 = vpop.sfrf %1683 }
 0x342   :  { %p2086_p3 = scmp.ne.s32.totalorder %s1684_s5, 0 }
 0x344   :  { %1688 = shalt.err (%p2086_p3)  }
 0x345   :  { %1690 = vsyncmov [#allocation3 + $0x4] }
 0x348   :  { %s1691_s28 = vpop.sfrf %1690 }
 0x349   :  { %p2087_p4 = scmp.ne.s32.totalorder %s1691_s28, 0 }
 0x34b   :  { %1695 = shalt.err (%p2087_p4)  }
 0x34c   :  { %1697 = vsyncmov [#allocation3 + $0x5] }
 0x34f   :  { %s1698_s6 = vpop.sfrf %1697 }
 0x350   :  { %p2088_p5 = scmp.ne.s32.totalorder %s1698_s6, 0 }
 0x352   :  { %1702 = shalt.err (%p2088_p5)  }
 0x353   :  { %1704 = vsyncmov [#allocation3 + $0x6] }
 0x356   :  { %s1705_s29 = vpop.sfrf %1704 }
 0x357   :  { %p2089_p6 = scmp.ne.s32.totalorder %s1705_s29, 0 }
 0x359   :  { %1709 = shalt.err (%p2089_p6)  }
 0x35a   :  { %1711 = vsyncmov [#allocation3 + $0x7] }
 0x35d   :  { %s1712_s30 = vpop.sfrf %1711 }
 0x35e   :  { %p2090_p7 = scmp.ne.s32.totalorder %s1712_s30, 0 }
 0x360   :  { %1716 = shalt.err (%p2090_p7)  }
 0x361   :  { %1718 = vsyncmov [#allocation3 + $0x8] }
 0x364   :  { %s1719_s7 = vpop.sfrf %1718 }
 0x365   :  { %p2091_p8 = scmp.ne.s32.totalorder %s1719_s7, 0 }
 0x367   :  { %1723 = shalt.err (%p2091_p8)  }
 0x368   :  { %1725 = vsyncmov [#allocation3 + $0x9] }
 0x36b   :  { %s1726_s8 = vpop.sfrf %1725 }
 0x36c   :  { %p2092_p9 = scmp.ne.s32.totalorder %s1726_s8, 0 }
 0x36e   :  { %1730 = shalt.err (%p2092_p9)  }
 0x36f   :  { %1732 = vsyncmov [#allocation3 + $0xa] }
 0x372   :  { %s1733_s9 = vpop.sfrf %1732 }
 0x373   :  { %p2093_p10 = scmp.ne.s32.totalorder %s1733_s9, 0 }
 0x375   :  { %1737 = shalt.err (%p2093_p10)  }
 0x376   :  { %1739 = vsyncmov [#allocation3 + $0xb] }
 0x379   :  { %s1740_s10 = vpop.sfrf %1739 }
 0x37a   :  { %p2094_p11 = scmp.ne.s32.totalorder %s1740_s10, 0 }
 0x37c   :  { %1744 = shalt.err (%p2094_p11)  }
 0x37d   :  { %1746 = vsyncmov [#allocation3 + $0xc] }
 0x380   :  { %s1747_s11 = vpop.sfrf %1746 }
 0x381   :  { %p2095_p12 = scmp.ne.s32.totalorder %s1747_s11, 0 }
 0x383   :  { %1751 = shalt.err (%p2095_p12)  }
 0x384   :  { %1753 = vsyncmov [#allocation3 + $0xd] }
 0x387   :  { %s1754_s12 = vpop.sfrf %1753 }
 0x388   :  { %p2096_p13 = scmp.ne.s32.totalorder %s1754_s12, 0 }
 0x38a   :  { %1758 = shalt.err (%p2096_p13)  }
 0x38b   :  { %1760 = vsyncmov [#allocation3 + $0xe] }
 0x38e   :  { %s1761_s13 = vpop.sfrf %1760 }
 0x38f   :  { %p2097_p0 = scmp.ne.s32.totalorder %s1761_s13, 0 }
 0x391   :  { %1765 = shalt.err (%p2097_p0)  }
 0x392   :  { %1767 = vsyncmov [#allocation3 + $0xf] }
 0x395   :  { %s1768_s14 = vpop.sfrf %1767 }
 0x396   :  { %p2098_p1 = scmp.ne.s32.totalorder %s1768_s14, 0 }
 0x398   :  { %1772 = shalt.err (%p2098_p1)  }
 0x399   :  { %1774 = vsyncmov [#allocation3 + $0x10] }
 0x39c   :  { %s1775_s15 = vpop.sfrf %1774 }
 0x39d   :  { %p2099_p2 = scmp.ne.s32.totalorder %s1775_s15, 0 }
 0x39f   :  { %1779 = shalt.err (%p2099_p2)  }
 0x3a0   :  { %1781 = vsyncmov [#allocation3 + $0x11] }
 0x3a3   :  { %s1782_s16 = vpop.sfrf %1781 }
 0x3a4   :  { %p2100_p3 = scmp.ne.s32.totalorder %s1782_s16, 0 }
 0x3a6   :  { %1786 = shalt.err (%p2100_p3)  }
 0x3a7   :  { %1788 = vsyncmov [#allocation3 + $0x12] }
 0x3aa   :  { %s1789_s17 = vpop.sfrf %1788 }
 0x3ab   :  { %p2101_p4 = scmp.ne.s32.totalorder %s1789_s17, 0 }
 0x3ad   :  { %1793 = shalt.err (%p2101_p4)  }
 0x3ae   :  { %1795 = vsyncmov [#allocation3 + $0x13] }
 0x3b1   :  { %s1796_s18 = vpop.sfrf %1795 }
 0x3b2   :  { %p2102_p5 = scmp.ne.s32.totalorder %s1796_s18, 0 }
 0x3b4   :  { %1800 = shalt.err (%p2102_p5)  }
 0x3b5   :  { %1802 = vsyncmov [#allocation3 + $0x14] }
 0x3b8   :  { %s1803_s19 = vpop.sfrf %1802 }
 0x3b9   :  { %p2103_p6 = scmp.ne.s32.totalorder %s1803_s19, 0 }
 0x3bb   :  { %1807 = shalt.err (%p2103_p6)  }
 0x3bc   :  { %1809 = vsyncmov [#allocation3 + $0x15] }
 0x3bf   :  { %s1810_s20 = vpop.sfrf %1809 }
 0x3c0   :  { %p2104_p7 = scmp.ne.s32.totalorder %s1810_s20, 0 }
 0x3c2   :  { %1814 = shalt.err (%p2104_p7)  }
 0x3c3   :  { %1816 = vsyncmov [#allocation3 + $0x16] }
 0x3c6   :  { %s1817_s21 = vpop.sfrf %1816 }
 0x3c7   :  { %p2105_p8 = scmp.ne.s32.totalorder %s1817_s21, 0 }
 0x3c9   :  { %1821 = shalt.err (%p2105_p8)  }
 0x3ca   :  { %1823 = vsyncmov [#allocation3 + $0x17] }
 0x3cd   :  { %s1824_s22 = vpop.sfrf %1823 }
 0x3ce   :  { %p2106_p9 = scmp.ne.s32.totalorder %s1824_s22, 0 }
 0x3d0   :  { %1828 = shalt.err (%p2106_p9)  }
 0x3d1   :  { %1830 = vsyncmov [#allocation3 + $0x18] }
 0x3d4   :  { %s1831_s23 = vpop.sfrf %1830 }
 0x3d5   :  { %p2107_p10 = scmp.ne.s32.totalorder %s1831_s23, 0 }
 0x3d7   :  { %1835 = shalt.err (%p2107_p10)  }
 0x3d8   :  { %1837 = vsyncmov [#allocation3 + $0x19] }
 0x3db   :  { %s1838_s2 = vpop.sfrf %1837 }
 0x3dc   :  { %p2108_p11 = scmp.ne.s32.totalorder %s1838_s2, 0 }
 0x3de   :  { %1842 = shalt.err (%p2108_p11)  }
 0x3df   :  { %1844 = vsyncmov [#allocation3 + $0x1a] }
 0x3e2   :  { %s1845_s24 = vpop.sfrf %1844 }
 0x3e3   :  { %p2109_p12 = scmp.ne.s32.totalorder %s1845_s24, 0 }
 0x3e5   :  { %1849 = shalt.err (%p2109_p12)  }
 0x3e6   :  { %1851 = vsyncmov [#allocation3 + $0x1b] }
 0x3e9   :  { %s1852_s3 = vpop.sfrf %1851 }
 0x3ea   :  { %p2110_p13 = scmp.ne.s32.totalorder %s1852_s3, 0 }
 0x3ec   :  { %1856 = shalt.err (%p2110_p13)  }
 0x3ed   :  { %1858 = vsyncmov [#allocation3 + $0x1c] }
 0x3f0   :  { %s1859_s1 = vpop.sfrf %1858 }
 0x3f1   :  { %p2111_p0 = scmp.ne.s32.totalorder %s1859_s1, 0 }
 0x3f3   :  { %1863 = shalt.err (%p2111_p0)  }
 0x3f4   :  { %1865 = vsyncmov [#allocation3 + $0x1d] }
 0x3f7   :  { %s1866_s4 = vpop.sfrf %1865 }
 0x3f8   :  { %p2112_p1 = scmp.ne.s32.totalorder %s1866_s4, 0 }
 0x3fa   :  { %1870 = shalt.err (%p2112_p1)  }
 0x3fb   :  { %1872 = vsyncmov [#allocation3 + $0x1e] }
 0x3fe   :  { %s1873_s25 = vpop.sfrf %1872 }
 0x3ff   :  { %p2113_p2 = scmp.ne.s32.totalorder %s1873_s25, 0 }
 0x401   :  { %1877 = shalt.err (%p2113_p2)  }
 0x402   :  { %1879 = vsyncmov [#allocation3 + $0x1f] }
 0x405   :  { %s1880_s26 = vpop.sfrf %1879 }
 0x406   :  { %p2114_p3 = scmp.ne.s32.totalorder %s1880_s26, 0 }
 0x408   :  { %1884 = shalt.err (%p2114_p3)  }

</bundles_post_ra>
